<compile_context>
chip_gen: v7x
topology: tpu7x:2x2x1
jax: 0.10.0
libtpu: 0.0.40
codegen_flags: <defaults>
</compile_context>

<pallas_src>
import functools

import jax
import jax.numpy as jnp
from jax.experimental import pallas as pl
from jax.experimental.pallas import tpu as pltpu

# ----------------------------- config ---------------------------------------
VOCAB = 100
MAX_POS = 16
HIDDEN = 32
NUM_HEADS = 2
HEAD_DIM = HIDDEN // NUM_HEADS
INTERMEDIATE = 64
NUM_LAYERS = 2
NUM_CLASSES = 3
LN_EPS = 1e-12

BATCH = 2
SEQ = 8


# ----------------------------- kernel helpers -------------------------------
def _layernorm(x, g, b, eps=LN_EPS):
    mu = jnp.mean(x, axis=-1, keepdims=True)
    var = jnp.mean(jnp.square(x - mu), axis=-1, keepdims=True)
    return (x - mu) * jax.lax.rsqrt(var + eps) * g + b


def _gelu(x):
    # TODO(synk): HF BERT default uses erf-GELU; tanh-approx differs by ~1e-3.
    c = 0.7978845608028654  # sqrt(2/pi)
    return 0.5 * x * (1.0 + jnp.tanh(c * (x + 0.044715 * x * x * x)))


# ----------------------------- fused kernel ---------------------------------
def _bert_kernel(emb_ref, mask_ref,
                 emb_g_ref, emb_b_ref,
                 wqkv_ref, bqkv_ref, wo_ref, bo_ref, ln1g_ref, ln1b_ref,
                 w1_ref, b1_ref, w2_ref, b2_ref, ln2g_ref, ln2b_ref,
                 wp_ref, bp_ref, wfc_ref, bfc_ref,
                 o_ref, *, batch, seq, num_heads, head_dim, num_layers):
    """Whole BERT classifier forward for one (tiny) batch, fully VMEM-resident."""
    hdim = num_heads * head_dim
    rows = batch * seq
    scale = 1.0 / (head_dim ** 0.5)

    # Embedding LayerNorm (no residual; the zeros residual was removed).
    h = _layernorm(emb_ref[...].astype(jnp.float32),
                   emb_g_ref[...], emb_b_ref[...])                 # (rows, H)

    mask = mask_ref[...]                                           # (B, 1, S) additive

    for li in range(num_layers):                                   # static unroll
        # ---- fused QKV projection: one (rows,H) @ (H,3H) MXU push ----------
        qkv = (jnp.dot(h, wqkv_ref[li], preferred_element_type=jnp.float32)
               + bqkv_ref[li])                                     # (rows, 3H)
        q = qkv[:, 0 * hdim:1 * hdim].reshape(batch, seq, hdim)
        k = qkv[:, 1 * hdim:2 * hdim].reshape(batch, seq, hdim)
        v = qkv[:, 2 * hdim:3 * hdim].reshape(batch, seq, hdim)

        # ---- attention: all batch elements at once, static loop over heads -
        ctx_heads = []
        for hi in range(num_heads):
            lo = hi * head_dim
            qh = q[:, :, lo:lo + head_dim]                         # (B, S, D)
            kh = k[:, :, lo:lo + head_dim]
            vh = v[:, :, lo:lo + head_dim]
            s = jnp.einsum("bqd,bkd->bqk", qh, kh,
                           preferred_element_type=jnp.float32) * scale
            s = s + mask                                           # key padding mask
            s = s - jnp.max(s, axis=-1, keepdims=True)
            p = jnp.exp(s)
            p = p * pl.reciprocal(jnp.sum(p, axis=-1, keepdims=True), approx=True)
            ctx_heads.append(jnp.einsum("bqk,bkd->bqd", p, vh,
                                        preferred_element_type=jnp.float32))
        ctx = jnp.concatenate(ctx_heads, axis=-1).reshape(rows, hdim)

        # ---- attention output projection + residual + LN1 ------------------
        attn_out = (jnp.dot(ctx, wo_ref[li], preferred_element_type=jnp.float32)
                    + bo_ref[li])
        h = _layernorm(attn_out + h, ln1g_ref[li], ln1b_ref[li])

        # ---- FFN (w1 + GELU + w2) + residual + LN2 --------------------------
        ff = _gelu(jnp.dot(h, w1_ref[li], preferred_element_type=jnp.float32)
                   + b1_ref[li])
        ff = jnp.dot(ff, w2_ref[li], preferred_element_type=jnp.float32) + b2_ref[li]
        h = _layernorm(ff + h, ln2g_ref[li], ln2b_ref[li])

    # ---- pooler: tanh(W_p * h[:, 0, :] + b_p) -------------------------------
    cls = jnp.concatenate([h[b * seq:b * seq + 1, :] for b in range(batch)], axis=0)
    pooled = jnp.tanh(jnp.dot(cls, wp_ref[...], preferred_element_type=jnp.float32)
                      + bp_ref[...])

    # nn.Dropout(0.1) -> identity at inference.
    logits = (jnp.dot(pooled, wfc_ref[...], preferred_element_type=jnp.float32)
              + bfc_ref[...])
    o_ref[...] = logits.astype(o_ref.dtype)


# ----------------------------- parameters -----------------------------------
def init_params(key):
    def dense(key, fan_in, fan_out):
        return jax.random.normal(key, (fan_in, fan_out), jnp.float32) * 0.02

    keys = jax.random.split(key, 4 + NUM_LAYERS)
    params = {
        "word_emb": jax.random.normal(keys[0], (VOCAB, HIDDEN), jnp.float32) * 0.02,
        "pos_emb": jax.random.normal(keys[1], (MAX_POS, HIDDEN), jnp.float32) * 0.02,
        "type_emb": jax.random.normal(keys[2], (2, HIDDEN), jnp.float32) * 0.02,
        "emb_ln_g": jnp.ones((HIDDEN,), jnp.float32),
        "emb_ln_b": jnp.zeros((HIDDEN,), jnp.float32),
        "layers": [],
    }
    for li in range(NUM_LAYERS):
        lk = jax.random.split(keys[3 + li], 6)
        params["layers"].append({
            "wq": dense(lk[0], HIDDEN, HIDDEN), "bq": jnp.zeros((HIDDEN,), jnp.float32),
            "wk": dense(lk[1], HIDDEN, HIDDEN), "bk": jnp.zeros((HIDDEN,), jnp.float32),
            "wv": dense(lk[2], HIDDEN, HIDDEN), "bv": jnp.zeros((HIDDEN,), jnp.float32),
            "wo": dense(lk[3], HIDDEN, HIDDEN), "bo": jnp.zeros((HIDDEN,), jnp.float32),
            "ln1_g": jnp.ones((HIDDEN,), jnp.float32), "ln1_b": jnp.zeros((HIDDEN,), jnp.float32),
            "w1": dense(lk[4], HIDDEN, INTERMEDIATE), "b1": jnp.zeros((INTERMEDIATE,), jnp.float32),
            "w2": dense(lk[5], INTERMEDIATE, HIDDEN), "b2": jnp.zeros((HIDDEN,), jnp.float32),
            "ln2_g": jnp.ones((HIDDEN,), jnp.float32), "ln2_b": jnp.zeros((HIDDEN,), jnp.float32),
        })
    pkey, fkey = jax.random.split(keys[3 + NUM_LAYERS], 2)
    params["wp"] = dense(pkey, HIDDEN, HIDDEN)
    params["bp"] = jnp.zeros((HIDDEN,), jnp.float32)
    params["wfc"] = dense(fkey, HIDDEN, NUM_CLASSES)
    params["bfc"] = jnp.zeros((NUM_CLASSES,), jnp.float32)
    return params


# ----------------------------- forward --------------------------------------
def bert_classifier_forward(params, input_ids, attention_mask):
    B, S = input_ids.shape

    # Embedding gathers stay as plain-JAX glue (data-dependent gather).
    word = jnp.take(params["word_emb"], input_ids, axis=0)        # (B, S, H)
    pos = params["pos_emb"][:S][None, :, :]                       # (1, S, H)
    tok = params["type_emb"][0][None, None, :]                    # token_type_ids = 0
    emb = (word + pos + tok).reshape(B * S, HIDDEN)

    # HF-style additive attention mask: 0 where attended, -1e4 where masked.
    addmask = ((1.0 - attention_mask.astype(jnp.float32)) * -10000.0).reshape(B, 1, S)

    # Stack per-layer weights so a single kernel sees them all (static layer loop).
    L = params["layers"]
    wqkv = jnp.stack([jnp.concatenate([l["wq"], l["wk"], l["wv"]], axis=1) for l in L])
    bqkv = jnp.stack([jnp.concatenate([l["bq"], l["bk"], l["bv"]])[None, :] for l in L])
    wo = jnp.stack([l["wo"] for l in L])
    bo = jnp.stack([l["bo"][None, :] for l in L])
    ln1g = jnp.stack([l["ln1_g"][None, :] for l in L])
    ln1b = jnp.stack([l["ln1_b"][None, :] for l in L])
    w1 = jnp.stack([l["w1"] for l in L])
    b1 = jnp.stack([l["b1"][None, :] for l in L])
    w2 = jnp.stack([l["w2"] for l in L])
    b2 = jnp.stack([l["b2"][None, :] for l in L])
    ln2g = jnp.stack([l["ln2_g"][None, :] for l in L])
    ln2b = jnp.stack([l["ln2_b"][None, :] for l in L])

    vspec = pl.BlockSpec(memory_space=pltpu.MemorySpace.VMEM)
    kernel = functools.partial(
        _bert_kernel, batch=B, seq=S, num_heads=NUM_HEADS,
        head_dim=HEAD_DIM, num_layers=NUM_LAYERS)

    return pl.pallas_call(
        kernel,
        out_shape=jax.ShapeDtypeStruct((B, NUM_CLASSES), jnp.float32),
        in_specs=[vspec] * 20,
        out_specs=vspec,
    )(emb, addmask,
      params["emb_ln_g"][None, :], params["emb_ln_b"][None, :],
      wqkv, bqkv, wo, bo, ln1g, ln1b, w1, b1, w2, b2, ln2g, ln2b,
      params["wp"], params["bp"][None, :],
      params["wfc"], params["bfc"][None, :])


# ----------------------------- main ------------------------------------------
if __name__ == "__main__":
    root = jax.random.PRNGKey(0)
    pkey, ikey = jax.random.split(root)

    params = init_params(pkey)
    input_ids = jax.random.randint(ikey, (BATCH, SEQ), 0, VOCAB, dtype=jnp.int32)
    attention_mask = jnp.ones((BATCH, SEQ), dtype=jnp.int32)
    attention_mask = attention_mask.at[1, SEQ - 2:].set(0)   # pad tail of 2nd example

    logits = bert_classifier_forward(params, input_ids, attention_mask)
    jax.block_until_ready(logits)
    assert logits.shape == (BATCH, NUM_CLASSES)
    print("KERNEL_OK")
</pallas_src>

<mosaic_0001>
module attributes {stable_mosaic.version = 11 : i64} {
  func.func @_bert_kernel(%arg0: memref<16x32xf32, #tpu.memory_space<vmem>>, %arg1: memref<2x1x8xf32, #tpu.memory_space<vmem>>, %arg2: memref<1x32xf32, #tpu.memory_space<vmem>>, %arg3: memref<1x32xf32, #tpu.memory_space<vmem>>, %arg4: memref<2x32x96xf32, #tpu.memory_space<vmem>>, %arg5: memref<2x1x96xf32, #tpu.memory_space<vmem>>, %arg6: memref<2x32x32xf32, #tpu.memory_space<vmem>>, %arg7: memref<2x1x32xf32, #tpu.memory_space<vmem>>, %arg8: memref<2x1x32xf32, #tpu.memory_space<vmem>>, %arg9: memref<2x1x32xf32, #tpu.memory_space<vmem>>, %arg10: memref<2x32x64xf32, #tpu.memory_space<vmem>>, %arg11: memref<2x1x64xf32, #tpu.memory_space<vmem>>, %arg12: memref<2x64x32xf32, #tpu.memory_space<vmem>>, %arg13: memref<2x1x32xf32, #tpu.memory_space<vmem>>, %arg14: memref<2x1x32xf32, #tpu.memory_space<vmem>>, %arg15: memref<2x1x32xf32, #tpu.memory_space<vmem>>, %arg16: memref<32x32xf32, #tpu.memory_space<vmem>>, %arg17: memref<1x32xf32, #tpu.memory_space<vmem>>, %arg18: memref<32x3xf32, #tpu.memory_space<vmem>>, %arg19: memref<1x3xf32, #tpu.memory_space<vmem>>, %arg20: memref<2x3xf32, #tpu.memory_space<vmem>>) attributes {dimension_semantics = [], scalar_prefetch = 0 : i64, scratch_operands = 0 : i64, tpu.core_type = #tpu.core_type<tc>} {
    %c0 = arith.constant 0 : index
    %c0_0 = arith.constant 0 : index
    %0 = vector.load %arg0[%c0, %c0_0] : memref<16x32xf32, #tpu.memory_space<vmem>>, vector<16x32xf32>
    %c0_1 = arith.constant 0 : index
    %c0_2 = arith.constant 0 : index
    %1 = vector.load %arg2[%c0_1, %c0_2] : memref<1x32xf32, #tpu.memory_space<vmem>>, vector<1x32xf32>
    %c0_3 = arith.constant 0 : index
    %c0_4 = arith.constant 0 : index
    %2 = vector.load %arg3[%c0_3, %c0_4] : memref<1x32xf32, #tpu.memory_space<vmem>>, vector<1x32xf32>
    %cst = arith.constant dense<0.000000e+00> : vector<16xf32>
    %3 = vector.multi_reduction <add>, %0, %cst [1] : vector<16x32xf32> to vector<16xf32>
    %4 = vector.shape_cast %3 : vector<16xf32> to vector<16x1xf32>
    %cst_5 = arith.constant 3.200000e+01 : f32
    %5 = vector.broadcast %cst_5 : f32 to vector<16x1xf32>
    %6 = arith.divf %4, %5 : vector<16x1xf32>
    %7 = vector.broadcast %6 : vector<16x1xf32> to vector<16x32xf32>
    %8 = arith.subf %0, %7 : vector<16x32xf32>
    %9 = arith.mulf %8, %8 : vector<16x32xf32>
    %cst_6 = arith.constant dense<0.000000e+00> : vector<16xf32>
    %10 = vector.multi_reduction <add>, %9, %cst_6 [1] : vector<16x32xf32> to vector<16xf32>
    %11 = vector.shape_cast %10 : vector<16xf32> to vector<16x1xf32>
    %cst_7 = arith.constant 3.200000e+01 : f32
    %12 = vector.broadcast %cst_7 : f32 to vector<16x1xf32>
    %13 = arith.divf %11, %12 : vector<16x1xf32>
    %14 = vector.broadcast %6 : vector<16x1xf32> to vector<16x32xf32>
    %15 = arith.subf %0, %14 : vector<16x32xf32>
    %cst_8 = arith.constant 9.99999996E-13 : f32
    %16 = vector.broadcast %cst_8 : f32 to vector<16x1xf32>
    %17 = arith.addf %13, %16 : vector<16x1xf32>
    %18 = math.rsqrt %17 : vector<16x1xf32>
    %19 = vector.broadcast %18 : vector<16x1xf32> to vector<16x32xf32>
    %20 = arith.mulf %15, %19 : vector<16x32xf32>
    %21 = vector.broadcast %1 : vector<1x32xf32> to vector<16x32xf32>
    %22 = arith.mulf %20, %21 : vector<16x32xf32>
    %23 = vector.broadcast %2 : vector<1x32xf32> to vector<16x32xf32>
    %24 = arith.addf %22, %23 : vector<16x32xf32>
    %c0_9 = arith.constant 0 : index
    %c0_10 = arith.constant 0 : index
    %c0_11 = arith.constant 0 : index
    %25 = vector.load %arg1[%c0_9, %c0_10, %c0_11] : memref<2x1x8xf32, #tpu.memory_space<vmem>>, vector<2x1x8xf32>
    %c0_12 = arith.constant 0 : index
    %c0_13 = arith.constant 0 : index
    %c0_14 = arith.constant 0 : index
    %26 = vector.load %arg4[%c0_12, %c0_13, %c0_14] : memref<2x32x96xf32, #tpu.memory_space<vmem>>, vector<1x32x96xf32>
    %27 = vector.shape_cast %26 : vector<1x32x96xf32> to vector<32x96xf32>
    %cst_15 = arith.constant dense<0.000000e+00> : vector<16x96xf32>
    %28 = tpu.matmul %24, %27, %cst_15 {dimension_numbers = #tpu.dot_dimension_numbers<[1], [0], [0], [1], [0, 0, 1, 1], [], []>} : vector<16x32xf32>, vector<32x96xf32>, vector<16x96xf32> -> vector<16x96xf32>
    %c0_16 = arith.constant 0 : index
    %c0_17 = arith.constant 0 : index
    %c0_18 = arith.constant 0 : index
    %29 = vector.load %arg5[%c0_16, %c0_17, %c0_18] : memref<2x1x96xf32, #tpu.memory_space<vmem>>, vector<1x1x96xf32>
    %30 = vector.shape_cast %29 : vector<1x1x96xf32> to vector<1x96xf32>
    %31 = vector.broadcast %30 : vector<1x96xf32> to vector<16x96xf32>
    %32 = arith.addf %28, %31 : vector<16x96xf32>
    %33 = vector.extract_strided_slice %32 {offsets = [0, 0], sizes = [16, 32], strides = [1, 1]} : vector<16x96xf32> to vector<16x32xf32>
    %34 = vector.shape_cast %33 : vector<16x32xf32> to vector<2x8x32xf32>
    %35 = vector.extract_strided_slice %32 {offsets = [0, 32], sizes = [16, 32], strides = [1, 1]} : vector<16x96xf32> to vector<16x32xf32>
    %36 = vector.shape_cast %35 : vector<16x32xf32> to vector<2x8x32xf32>
    %37 = vector.extract_strided_slice %32 {offsets = [0, 64], sizes = [16, 32], strides = [1, 1]} : vector<16x96xf32> to vector<16x32xf32>
    %38 = vector.shape_cast %37 : vector<16x32xf32> to vector<2x8x32xf32>
    %39 = vector.extract_strided_slice %34 {offsets = [0, 0, 0], sizes = [2, 8, 16], strides = [1, 1, 1]} : vector<2x8x32xf32> to vector<2x8x16xf32>
    %40 = vector.extract_strided_slice %36 {offsets = [0, 0, 0], sizes = [2, 8, 16], strides = [1, 1, 1]} : vector<2x8x32xf32> to vector<2x8x16xf32>
    %41 = vector.extract_strided_slice %38 {offsets = [0, 0, 0], sizes = [2, 8, 16], strides = [1, 1, 1]} : vector<2x8x32xf32> to vector<2x8x16xf32>
    "tpu.trace_start"() <{level = 10 : i32, message = "bqd,bkd->bqk"}> : () -> ()
    %cst_19 = arith.constant dense<0.000000e+00> : vector<2x8x8xf32>
    %42 = tpu.matmul %39, %40, %cst_19 {dimension_numbers = #tpu.dot_dimension_numbers<[2], [2], [1], [1], [0, 0, 0, 1, 1, 1], [0], [0]>} : vector<2x8x16xf32>, vector<2x8x16xf32>, vector<2x8x8xf32> -> vector<2x8x8xf32>
    "tpu.trace_stop"() : () -> ()
    %cst_20 = arith.constant 2.500000e-01 : f32
    %43 = vector.broadcast %cst_20 : f32 to vector<2x8x8xf32>
    %44 = arith.mulf %42, %43 : vector<2x8x8xf32>
    %45 = vector.broadcast %25 : vector<2x1x8xf32> to vector<2x8x8xf32>
    %46 = arith.addf %44, %45 : vector<2x8x8xf32>
    %cst_21 = arith.constant dense<0xFF800000> : vector<2x8xf32>
    %47 = vector.multi_reduction <maximumf>, %46, %cst_21 [2] : vector<2x8x8xf32> to vector<2x8xf32>
    %48 = vector.shape_cast %47 : vector<2x8xf32> to vector<2x8x1xf32>
    %49 = vector.broadcast %48 : vector<2x8x1xf32> to vector<2x8x8xf32>
    %50 = arith.subf %46, %49 : vector<2x8x8xf32>
    %51 = math.exp %50 : vector<2x8x8xf32>
    %cst_22 = arith.constant dense<0.000000e+00> : vector<2x8xf32>
    %52 = vector.multi_reduction <add>, %51, %cst_22 [2] : vector<2x8x8xf32> to vector<2x8xf32>
    %53 = vector.shape_cast %52 : vector<2x8xf32> to vector<2x8x1xf32>
    %54 = tpu.reciprocal %53 {approx = true} : vector<2x8x1xf32> -> vector<2x8x1xf32>
    %55 = vector.broadcast %54 : vector<2x8x1xf32> to vector<2x8x8xf32>
    %56 = arith.mulf %51, %55 : vector<2x8x8xf32>
    "tpu.trace_start"() <{level = 10 : i32, message = "bqk,bkd->bqd"}> : () -> ()
    %cst_23 = arith.constant dense<0.000000e+00> : vector<2x8x16xf32>
    %57 = tpu.matmul %56, %41, %cst_23 {dimension_numbers = #tpu.dot_dimension_numbers<[2], [1], [1], [2], [0, 0, 0, 1, 1, 2], [0], [0]>} : vector<2x8x8xf32>, vector<2x8x16xf32>, vector<2x8x16xf32> -> vector<2x8x16xf32>
    "tpu.trace_stop"() : () -> ()
    %58 = vector.extract_strided_slice %34 {offsets = [0, 0, 16], sizes = [2, 8, 16], strides = [1, 1, 1]} : vector<2x8x32xf32> to vector<2x8x16xf32>
    %59 = vector.extract_strided_slice %36 {offsets = [0, 0, 16], sizes = [2, 8, 16], strides = [1, 1, 1]} : vector<2x8x32xf32> to vector<2x8x16xf32>
    %60 = vector.extract_strided_slice %38 {offsets = [0, 0, 16], sizes = [2, 8, 16], strides = [1, 1, 1]} : vector<2x8x32xf32> to vector<2x8x16xf32>
    "tpu.trace_start"() <{level = 10 : i32, message = "bqd,bkd->bqk"}> : () -> ()
    %cst_24 = arith.constant dense<0.000000e+00> : vector<2x8x8xf32>
    %61 = tpu.matmul %58, %59, %cst_24 {dimension_numbers = #tpu.dot_dimension_numbers<[2], [2], [1], [1], [0, 0, 0, 1, 1, 1], [0], [0]>} : vector<2x8x16xf32>, vector<2x8x16xf32>, vector<2x8x8xf32> -> vector<2x8x8xf32>
    "tpu.trace_stop"() : () -> ()
    %cst_25 = arith.constant 2.500000e-01 : f32
    %62 = vector.broadcast %cst_25 : f32 to vector<2x8x8xf32>
    %63 = arith.mulf %61, %62 : vector<2x8x8xf32>
    %64 = vector.broadcast %25 : vector<2x1x8xf32> to vector<2x8x8xf32>
    %65 = arith.addf %63, %64 : vector<2x8x8xf32>
    %cst_26 = arith.constant dense<0xFF800000> : vector<2x8xf32>
    %66 = vector.multi_reduction <maximumf>, %65, %cst_26 [2] : vector<2x8x8xf32> to vector<2x8xf32>
    %67 = vector.shape_cast %66 : vector<2x8xf32> to vector<2x8x1xf32>
    %68 = vector.broadcast %67 : vector<2x8x1xf32> to vector<2x8x8xf32>
    %69 = arith.subf %65, %68 : vector<2x8x8xf32>
    %70 = math.exp %69 : vector<2x8x8xf32>
    %cst_27 = arith.constant dense<0.000000e+00> : vector<2x8xf32>
    %71 = vector.multi_reduction <add>, %70, %cst_27 [2] : vector<2x8x8xf32> to vector<2x8xf32>
    %72 = vector.shape_cast %71 : vector<2x8xf32> to vector<2x8x1xf32>
    %73 = tpu.reciprocal %72 {approx = true} : vector<2x8x1xf32> -> vector<2x8x1xf32>
    %74 = vector.broadcast %73 : vector<2x8x1xf32> to vector<2x8x8xf32>
    %75 = arith.mulf %70, %74 : vector<2x8x8xf32>
    "tpu.trace_start"() <{level = 10 : i32, message = "bqk,bkd->bqd"}> : () -> ()
    %cst_28 = arith.constant dense<0.000000e+00> : vector<2x8x16xf32>
    %76 = tpu.matmul %75, %60, %cst_28 {dimension_numbers = #tpu.dot_dimension_numbers<[2], [1], [1], [2], [0, 0, 0, 1, 1, 2], [0], [0]>} : vector<2x8x8xf32>, vector<2x8x16xf32>, vector<2x8x16xf32> -> vector<2x8x16xf32>
    "tpu.trace_stop"() : () -> ()
    %77 = tpu.concatenate %57, %76 in 2 : vector<2x8x16xf32>, vector<2x8x16xf32> -> vector<2x8x32xf32>
    %78 = vector.shape_cast %77 : vector<2x8x32xf32> to vector<16x32xf32>
    %c0_29 = arith.constant 0 : index
    %c0_30 = arith.constant 0 : index
    %c0_31 = arith.constant 0 : index
    %79 = vector.load %arg6[%c0_29, %c0_30, %c0_31] : memref<2x32x32xf32, #tpu.memory_space<vmem>>, vector<1x32x32xf32>
    %80 = vector.shape_cast %79 : vector<1x32x32xf32> to vector<32x32xf32>
    %cst_32 = arith.constant dense<0.000000e+00> : vector<16x32xf32>
    %81 = tpu.matmul %78, %80, %cst_32 {dimension_numbers = #tpu.dot_dimension_numbers<[1], [0], [0], [1], [0, 0, 1, 1], [], []>} : vector<16x32xf32>, vector<32x32xf32>, vector<16x32xf32> -> vector<16x32xf32>
    %c0_33 = arith.constant 0 : index
    %c0_34 = arith.constant 0 : index
    %c0_35 = arith.constant 0 : index
    %82 = vector.load %arg7[%c0_33, %c0_34, %c0_35] : memref<2x1x32xf32, #tpu.memory_space<vmem>>, vector<1x1x32xf32>
    %83 = vector.shape_cast %82 : vector<1x1x32xf32> to vector<1x32xf32>
    %84 = vector.broadcast %83 : vector<1x32xf32> to vector<16x32xf32>
    %85 = arith.addf %81, %84 : vector<16x32xf32>
    %86 = arith.addf %85, %24 : vector<16x32xf32>
    %c0_36 = arith.constant 0 : index
    %c0_37 = arith.constant 0 : index
    %c0_38 = arith.constant 0 : index
    %87 = vector.load %arg8[%c0_36, %c0_37, %c0_38] : memref<2x1x32xf32, #tpu.memory_space<vmem>>, vector<1x1x32xf32>
    %88 = vector.shape_cast %87 : vector<1x1x32xf32> to vector<1x32xf32>
    %c0_39 = arith.constant 0 : index
    %c0_40 = arith.constant 0 : index
    %c0_41 = arith.constant 0 : index
    %89 = vector.load %arg9[%c0_39, %c0_40, %c0_41] : memref<2x1x32xf32, #tpu.memory_space<vmem>>, vector<1x1x32xf32>
    %90 = vector.shape_cast %89 : vector<1x1x32xf32> to vector<1x32xf32>
    %cst_42 = arith.constant dense<0.000000e+00> : vector<16xf32>
    %91 = vector.multi_reduction <add>, %86, %cst_42 [1] : vector<16x32xf32> to vector<16xf32>
    %92 = vector.shape_cast %91 : vector<16xf32> to vector<16x1xf32>
    %cst_43 = arith.constant 3.200000e+01 : f32
    %93 = vector.broadcast %cst_43 : f32 to vector<16x1xf32>
    %94 = arith.divf %92, %93 : vector<16x1xf32>
    %95 = vector.broadcast %94 : vector<16x1xf32> to vector<16x32xf32>
    %96 = arith.subf %86, %95 : vector<16x32xf32>
    %97 = arith.mulf %96, %96 : vector<16x32xf32>
    %cst_44 = arith.constant dense<0.000000e+00> : vector<16xf32>
    %98 = vector.multi_reduction <add>, %97, %cst_44 [1] : vector<16x32xf32> to vector<16xf32>
    %99 = vector.shape_cast %98 : vector<16xf32> to vector<16x1xf32>
    %cst_45 = arith.constant 3.200000e+01 : f32
    %100 = vector.broadcast %cst_45 : f32 to vector<16x1xf32>
    %101 = arith.divf %99, %100 : vector<16x1xf32>
    %102 = vector.broadcast %94 : vector<16x1xf32> to vector<16x32xf32>
    %103 = arith.subf %86, %102 : vector<16x32xf32>
    %cst_46 = arith.constant 9.99999996E-13 : f32
    %104 = vector.broadcast %cst_46 : f32 to vector<16x1xf32>
    %105 = arith.addf %101, %104 : vector<16x1xf32>
    %106 = math.rsqrt %105 : vector<16x1xf32>
    %107 = vector.broadcast %106 : vector<16x1xf32> to vector<16x32xf32>
    %108 = arith.mulf %103, %107 : vector<16x32xf32>
    %109 = vector.broadcast %88 : vector<1x32xf32> to vector<16x32xf32>
    %110 = arith.mulf %108, %109 : vector<16x32xf32>
    %111 = vector.broadcast %90 : vector<1x32xf32> to vector<16x32xf32>
    %112 = arith.addf %110, %111 : vector<16x32xf32>
    %c0_47 = arith.constant 0 : index
    %c0_48 = arith.constant 0 : index
    %c0_49 = arith.constant 0 : index
    %113 = vector.load %arg10[%c0_47, %c0_48, %c0_49] : memref<2x32x64xf32, #tpu.memory_space<vmem>>, vector<1x32x64xf32>
    %114 = vector.shape_cast %113 : vector<1x32x64xf32> to vector<32x64xf32>
    %cst_50 = arith.constant dense<0.000000e+00> : vector<16x64xf32>
    %115 = tpu.matmul %112, %114, %cst_50 {dimension_numbers = #tpu.dot_dimension_numbers<[1], [0], [0], [1], [0, 0, 1, 1], [], []>} : vector<16x32xf32>, vector<32x64xf32>, vector<16x64xf32> -> vector<16x64xf32>
    %c0_51 = arith.constant 0 : index
    %c0_52 = arith.constant 0 : index
    %c0_53 = arith.constant 0 : index
    %116 = vector.load %arg11[%c0_51, %c0_52, %c0_53] : memref<2x1x64xf32, #tpu.memory_space<vmem>>, vector<1x1x64xf32>
    %117 = vector.shape_cast %116 : vector<1x1x64xf32> to vector<1x64xf32>
    %118 = vector.broadcast %117 : vector<1x64xf32> to vector<16x64xf32>
    %119 = arith.addf %115, %118 : vector<16x64xf32>
    %cst_54 = arith.constant 5.000000e-01 : f32
    %120 = vector.broadcast %cst_54 : f32 to vector<16x64xf32>
    %121 = arith.mulf %120, %119 : vector<16x64xf32>
    %cst_55 = arith.constant 4.471500e-02 : f32
    %122 = vector.broadcast %cst_55 : f32 to vector<16x64xf32>
    %123 = arith.mulf %122, %119 : vector<16x64xf32>
    %124 = arith.mulf %123, %119 : vector<16x64xf32>
    %125 = arith.mulf %124, %119 : vector<16x64xf32>
    %126 = arith.addf %119, %125 : vector<16x64xf32>
    %cst_56 = arith.constant 0.797884583 : f32
    %127 = vector.broadcast %cst_56 : f32 to vector<16x64xf32>
    %128 = arith.mulf %127, %126 : vector<16x64xf32>
    %129 = math.tanh %128 : vector<16x64xf32>
    %cst_57 = arith.constant 1.000000e+00 : f32
    %130 = vector.broadcast %cst_57 : f32 to vector<16x64xf32>
    %131 = arith.addf %130, %129 : vector<16x64xf32>
    %132 = arith.mulf %121, %131 : vector<16x64xf32>
    %c0_58 = arith.constant 0 : index
    %c0_59 = arith.constant 0 : index
    %c0_60 = arith.constant 0 : index
    %133 = vector.load %arg12[%c0_58, %c0_59, %c0_60] : memref<2x64x32xf32, #tpu.memory_space<vmem>>, vector<1x64x32xf32>
    %134 = vector.shape_cast %133 : vector<1x64x32xf32> to vector<64x32xf32>
    %cst_61 = arith.constant dense<0.000000e+00> : vector<16x32xf32>
    %135 = tpu.matmul %132, %134, %cst_61 {dimension_numbers = #tpu.dot_dimension_numbers<[1], [0], [0], [1], [0, 0, 1, 1], [], []>} : vector<16x64xf32>, vector<64x32xf32>, vector<16x32xf32> -> vector<16x32xf32>
    %c0_62 = arith.constant 0 : index
    %c0_63 = arith.constant 0 : index
    %c0_64 = arith.constant 0 : index
    %136 = vector.load %arg13[%c0_62, %c0_63, %c0_64] : memref<2x1x32xf32, #tpu.memory_space<vmem>>, vector<1x1x32xf32>
    %137 = vector.shape_cast %136 : vector<1x1x32xf32> to vector<1x32xf32>
    %138 = vector.broadcast %137 : vector<1x32xf32> to vector<16x32xf32>
    %139 = arith.addf %135, %138 : vector<16x32xf32>
    %140 = arith.addf %139, %112 : vector<16x32xf32>
    %c0_65 = arith.constant 0 : index
    %c0_66 = arith.constant 0 : index
    %c0_67 = arith.constant 0 : index
    %141 = vector.load %arg14[%c0_65, %c0_66, %c0_67] : memref<2x1x32xf32, #tpu.memory_space<vmem>>, vector<1x1x32xf32>
    %142 = vector.shape_cast %141 : vector<1x1x32xf32> to vector<1x32xf32>
    %c0_68 = arith.constant 0 : index
    %c0_69 = arith.constant 0 : index
    %c0_70 = arith.constant 0 : index
    %143 = vector.load %arg15[%c0_68, %c0_69, %c0_70] : memref<2x1x32xf32, #tpu.memory_space<vmem>>, vector<1x1x32xf32>
    %144 = vector.shape_cast %143 : vector<1x1x32xf32> to vector<1x32xf32>
    %cst_71 = arith.constant dense<0.000000e+00> : vector<16xf32>
    %145 = vector.multi_reduction <add>, %140, %cst_71 [1] : vector<16x32xf32> to vector<16xf32>
    %146 = vector.shape_cast %145 : vector<16xf32> to vector<16x1xf32>
    %cst_72 = arith.constant 3.200000e+01 : f32
    %147 = vector.broadcast %cst_72 : f32 to vector<16x1xf32>
    %148 = arith.divf %146, %147 : vector<16x1xf32>
    %149 = vector.broadcast %148 : vector<16x1xf32> to vector<16x32xf32>
    %150 = arith.subf %140, %149 : vector<16x32xf32>
    %151 = arith.mulf %150, %150 : vector<16x32xf32>
    %cst_73 = arith.constant dense<0.000000e+00> : vector<16xf32>
    %152 = vector.multi_reduction <add>, %151, %cst_73 [1] : vector<16x32xf32> to vector<16xf32>
    %153 = vector.shape_cast %152 : vector<16xf32> to vector<16x1xf32>
    %cst_74 = arith.constant 3.200000e+01 : f32
    %154 = vector.broadcast %cst_74 : f32 to vector<16x1xf32>
    %155 = arith.divf %153, %154 : vector<16x1xf32>
    %156 = vector.broadcast %148 : vector<16x1xf32> to vector<16x32xf32>
    %157 = arith.subf %140, %156 : vector<16x32xf32>
    %cst_75 = arith.constant 9.99999996E-13 : f32
    %158 = vector.broadcast %cst_75 : f32 to vector<16x1xf32>
    %159 = arith.addf %155, %158 : vector<16x1xf32>
    %160 = math.rsqrt %159 : vector<16x1xf32>
    %161 = vector.broadcast %160 : vector<16x1xf32> to vector<16x32xf32>
    %162 = arith.mulf %157, %161 : vector<16x32xf32>
    %163 = vector.broadcast %142 : vector<1x32xf32> to vector<16x32xf32>
    %164 = arith.mulf %162, %163 : vector<16x32xf32>
    %165 = vector.broadcast %144 : vector<1x32xf32> to vector<16x32xf32>
    %166 = arith.addf %164, %165 : vector<16x32xf32>
    %c1 = arith.constant 1 : index
    %c0_76 = arith.constant 0 : index
    %c0_77 = arith.constant 0 : index
    %167 = vector.load %arg4[%c1, %c0_76, %c0_77] : memref<2x32x96xf32, #tpu.memory_space<vmem>>, vector<1x32x96xf32>
    %168 = vector.shape_cast %167 : vector<1x32x96xf32> to vector<32x96xf32>
    %cst_78 = arith.constant dense<0.000000e+00> : vector<16x96xf32>
    %169 = tpu.matmul %166, %168, %cst_78 {dimension_numbers = #tpu.dot_dimension_numbers<[1], [0], [0], [1], [0, 0, 1, 1], [], []>} : vector<16x32xf32>, vector<32x96xf32>, vector<16x96xf32> -> vector<16x96xf32>
    %c1_79 = arith.constant 1 : index
    %c0_80 = arith.constant 0 : index
    %c0_81 = arith.constant 0 : index
    %170 = vector.load %arg5[%c1_79, %c0_80, %c0_81] : memref<2x1x96xf32, #tpu.memory_space<vmem>>, vector<1x1x96xf32>
    %171 = vector.shape_cast %170 : vector<1x1x96xf32> to vector<1x96xf32>
    %172 = vector.broadcast %171 : vector<1x96xf32> to vector<16x96xf32>
    %173 = arith.addf %169, %172 : vector<16x96xf32>
    %174 = vector.extract_strided_slice %173 {offsets = [0, 0], sizes = [16, 32], strides = [1, 1]} : vector<16x96xf32> to vector<16x32xf32>
    %175 = vector.shape_cast %174 : vector<16x32xf32> to vector<2x8x32xf32>
    %176 = vector.extract_strided_slice %173 {offsets = [0, 32], sizes = [16, 32], strides = [1, 1]} : vector<16x96xf32> to vector<16x32xf32>
    %177 = vector.shape_cast %176 : vector<16x32xf32> to vector<2x8x32xf32>
    %178 = vector.extract_strided_slice %173 {offsets = [0, 64], sizes = [16, 32], strides = [1, 1]} : vector<16x96xf32> to vector<16x32xf32>
    %179 = vector.shape_cast %178 : vector<16x32xf32> to vector<2x8x32xf32>
    %180 = vector.extract_strided_slice %175 {offsets = [0, 0, 0], sizes = [2, 8, 16], strides = [1, 1, 1]} : vector<2x8x32xf32> to vector<2x8x16xf32>
    %181 = vector.extract_strided_slice %177 {offsets = [0, 0, 0], sizes = [2, 8, 16], strides = [1, 1, 1]} : vector<2x8x32xf32> to vector<2x8x16xf32>
    %182 = vector.extract_strided_slice %179 {offsets = [0, 0, 0], sizes = [2, 8, 16], strides = [1, 1, 1]} : vector<2x8x32xf32> to vector<2x8x16xf32>
    "tpu.trace_start"() <{level = 10 : i32, message = "bqd,bkd->bqk"}> : () -> ()
    %cst_82 = arith.constant dense<0.000000e+00> : vector<2x8x8xf32>
    %183 = tpu.matmul %180, %181, %cst_82 {dimension_numbers = #tpu.dot_dimension_numbers<[2], [2], [1], [1], [0, 0, 0, 1, 1, 1], [0], [0]>} : vector<2x8x16xf32>, vector<2x8x16xf32>, vector<2x8x8xf32> -> vector<2x8x8xf32>
    "tpu.trace_stop"() : () -> ()
    %cst_83 = arith.constant 2.500000e-01 : f32
    %184 = vector.broadcast %cst_83 : f32 to vector<2x8x8xf32>
    %185 = arith.mulf %183, %184 : vector<2x8x8xf32>
    %186 = vector.broadcast %25 : vector<2x1x8xf32> to vector<2x8x8xf32>
    %187 = arith.addf %185, %186 : vector<2x8x8xf32>
    %cst_84 = arith.constant dense<0xFF800000> : vector<2x8xf32>
    %188 = vector.multi_reduction <maximumf>, %187, %cst_84 [2] : vector<2x8x8xf32> to vector<2x8xf32>
    %189 = vector.shape_cast %188 : vector<2x8xf32> to vector<2x8x1xf32>
    %190 = vector.broadcast %189 : vector<2x8x1xf32> to vector<2x8x8xf32>
    %191 = arith.subf %187, %190 : vector<2x8x8xf32>
    %192 = math.exp %191 : vector<2x8x8xf32>
    %cst_85 = arith.constant dense<0.000000e+00> : vector<2x8xf32>
    %193 = vector.multi_reduction <add>, %192, %cst_85 [2] : vector<2x8x8xf32> to vector<2x8xf32>
    %194 = vector.shape_cast %193 : vector<2x8xf32> to vector<2x8x1xf32>
    %195 = tpu.reciprocal %194 {approx = true} : vector<2x8x1xf32> -> vector<2x8x1xf32>
    %196 = vector.broadcast %195 : vector<2x8x1xf32> to vector<2x8x8xf32>
    %197 = arith.mulf %192, %196 : vector<2x8x8xf32>
    "tpu.trace_start"() <{level = 10 : i32, message = "bqk,bkd->bqd"}> : () -> ()
    %cst_86 = arith.constant dense<0.000000e+00> : vector<2x8x16xf32>
    %198 = tpu.matmul %197, %182, %cst_86 {dimension_numbers = #tpu.dot_dimension_numbers<[2], [1], [1], [2], [0, 0, 0, 1, 1, 2], [0], [0]>} : vector<2x8x8xf32>, vector<2x8x16xf32>, vector<2x8x16xf32> -> vector<2x8x16xf32>
    "tpu.trace_stop"() : () -> ()
    %199 = vector.extract_strided_slice %175 {offsets = [0, 0, 16], sizes = [2, 8, 16], strides = [1, 1, 1]} : vector<2x8x32xf32> to vector<2x8x16xf32>
    %200 = vector.extract_strided_slice %177 {offsets = [0, 0, 16], sizes = [2, 8, 16], strides = [1, 1, 1]} : vector<2x8x32xf32> to vector<2x8x16xf32>
    %201 = vector.extract_strided_slice %179 {offsets = [0, 0, 16], sizes = [2, 8, 16], strides = [1, 1, 1]} : vector<2x8x32xf32> to vector<2x8x16xf32>
    "tpu.trace_start"() <{level = 10 : i32, message = "bqd,bkd->bqk"}> : () -> ()
    %cst_87 = arith.constant dense<0.000000e+00> : vector<2x8x8xf32>
    %202 = tpu.matmul %199, %200, %cst_87 {dimension_numbers = #tpu.dot_dimension_numbers<[2], [2], [1], [1], [0, 0, 0, 1, 1, 1], [0], [0]>} : vector<2x8x16xf32>, vector<2x8x16xf32>, vector<2x8x8xf32> -> vector<2x8x8xf32>
    "tpu.trace_stop"() : () -> ()
    %cst_88 = arith.constant 2.500000e-01 : f32
    %203 = vector.broadcast %cst_88 : f32 to vector<2x8x8xf32>
    %204 = arith.mulf %202, %203 : vector<2x8x8xf32>
    %205 = vector.broadcast %25 : vector<2x1x8xf32> to vector<2x8x8xf32>
    %206 = arith.addf %204, %205 : vector<2x8x8xf32>
    %cst_89 = arith.constant dense<0xFF800000> : vector<2x8xf32>
    %207 = vector.multi_reduction <maximumf>, %206, %cst_89 [2] : vector<2x8x8xf32> to vector<2x8xf32>
    %208 = vector.shape_cast %207 : vector<2x8xf32> to vector<2x8x1xf32>
    %209 = vector.broadcast %208 : vector<2x8x1xf32> to vector<2x8x8xf32>
    %210 = arith.subf %206, %209 : vector<2x8x8xf32>
    %211 = math.exp %210 : vector<2x8x8xf32>
    %cst_90 = arith.constant dense<0.000000e+00> : vector<2x8xf32>
    %212 = vector.multi_reduction <add>, %211, %cst_90 [2] : vector<2x8x8xf32> to vector<2x8xf32>
    %213 = vector.shape_cast %212 : vector<2x8xf32> to vector<2x8x1xf32>
    %214 = tpu.reciprocal %213 {approx = true} : vector<2x8x1xf32> -> vector<2x8x1xf32>
    %215 = vector.broadcast %214 : vector<2x8x1xf32> to vector<2x8x8xf32>
    %216 = arith.mulf %211, %215 : vector<2x8x8xf32>
    "tpu.trace_start"() <{level = 10 : i32, message = "bqk,bkd->bqd"}> : () -> ()
    %cst_91 = arith.constant dense<0.000000e+00> : vector<2x8x16xf32>
    %217 = tpu.matmul %216, %201, %cst_91 {dimension_numbers = #tpu.dot_dimension_numbers<[2], [1], [1], [2], [0, 0, 0, 1, 1, 2], [0], [0]>} : vector<2x8x8xf32>, vector<2x8x16xf32>, vector<2x8x16xf32> -> vector<2x8x16xf32>
    "tpu.trace_stop"() : () -> ()
    %218 = tpu.concatenate %198, %217 in 2 : vector<2x8x16xf32>, vector<2x8x16xf32> -> vector<2x8x32xf32>
    %219 = vector.shape_cast %218 : vector<2x8x32xf32> to vector<16x32xf32>
    %c1_92 = arith.constant 1 : index
    %c0_93 = arith.constant 0 : index
    %c0_94 = arith.constant 0 : index
    %220 = vector.load %arg6[%c1_92, %c0_93, %c0_94] : memref<2x32x32xf32, #tpu.memory_space<vmem>>, vector<1x32x32xf32>
    %221 = vector.shape_cast %220 : vector<1x32x32xf32> to vector<32x32xf32>
    %cst_95 = arith.constant dense<0.000000e+00> : vector<16x32xf32>
    %222 = tpu.matmul %219, %221, %cst_95 {dimension_numbers = #tpu.dot_dimension_numbers<[1], [0], [0], [1], [0, 0, 1, 1], [], []>} : vector<16x32xf32>, vector<32x32xf32>, vector<16x32xf32> -> vector<16x32xf32>
    %c1_96 = arith.constant 1 : index
    %c0_97 = arith.constant 0 : index
    %c0_98 = arith.constant 0 : index
    %223 = vector.load %arg7[%c1_96, %c0_97, %c0_98] : memref<2x1x32xf32, #tpu.memory_space<vmem>>, vector<1x1x32xf32>
    %224 = vector.shape_cast %223 : vector<1x1x32xf32> to vector<1x32xf32>
    %225 = vector.broadcast %224 : vector<1x32xf32> to vector<16x32xf32>
    %226 = arith.addf %222, %225 : vector<16x32xf32>
    %227 = arith.addf %226, %166 : vector<16x32xf32>
    %c1_99 = arith.constant 1 : index
    %c0_100 = arith.constant 0 : index
    %c0_101 = arith.constant 0 : index
    %228 = vector.load %arg8[%c1_99, %c0_100, %c0_101] : memref<2x1x32xf32, #tpu.memory_space<vmem>>, vector<1x1x32xf32>
    %229 = vector.shape_cast %228 : vector<1x1x32xf32> to vector<1x32xf32>
    %c1_102 = arith.constant 1 : index
    %c0_103 = arith.constant 0 : index
    %c0_104 = arith.constant 0 : index
    %230 = vector.load %arg9[%c1_102, %c0_103, %c0_104] : memref<2x1x32xf32, #tpu.memory_space<vmem>>, vector<1x1x32xf32>
    %231 = vector.shape_cast %230 : vector<1x1x32xf32> to vector<1x32xf32>
    %cst_105 = arith.constant dense<0.000000e+00> : vector<16xf32>
    %232 = vector.multi_reduction <add>, %227, %cst_105 [1] : vector<16x32xf32> to vector<16xf32>
    %233 = vector.shape_cast %232 : vector<16xf32> to vector<16x1xf32>
    %cst_106 = arith.constant 3.200000e+01 : f32
    %234 = vector.broadcast %cst_106 : f32 to vector<16x1xf32>
    %235 = arith.divf %233, %234 : vector<16x1xf32>
    %236 = vector.broadcast %235 : vector<16x1xf32> to vector<16x32xf32>
    %237 = arith.subf %227, %236 : vector<16x32xf32>
    %238 = arith.mulf %237, %237 : vector<16x32xf32>
    %cst_107 = arith.constant dense<0.000000e+00> : vector<16xf32>
    %239 = vector.multi_reduction <add>, %238, %cst_107 [1] : vector<16x32xf32> to vector<16xf32>
    %240 = vector.shape_cast %239 : vector<16xf32> to vector<16x1xf32>
    %cst_108 = arith.constant 3.200000e+01 : f32
    %241 = vector.broadcast %cst_108 : f32 to vector<16x1xf32>
    %242 = arith.divf %240, %241 : vector<16x1xf32>
    %243 = vector.broadcast %235 : vector<16x1xf32> to vector<16x32xf32>
    %244 = arith.subf %227, %243 : vector<16x32xf32>
    %cst_109 = arith.constant 9.99999996E-13 : f32
    %245 = vector.broadcast %cst_109 : f32 to vector<16x1xf32>
    %246 = arith.addf %242, %245 : vector<16x1xf32>
    %247 = math.rsqrt %246 : vector<16x1xf32>
    %248 = vector.broadcast %247 : vector<16x1xf32> to vector<16x32xf32>
    %249 = arith.mulf %244, %248 : vector<16x32xf32>
    %250 = vector.broadcast %229 : vector<1x32xf32> to vector<16x32xf32>
    %251 = arith.mulf %249, %250 : vector<16x32xf32>
    %252 = vector.broadcast %231 : vector<1x32xf32> to vector<16x32xf32>
    %253 = arith.addf %251, %252 : vector<16x32xf32>
    %c1_110 = arith.constant 1 : index
    %c0_111 = arith.constant 0 : index
    %c0_112 = arith.constant 0 : index
    %254 = vector.load %arg10[%c1_110, %c0_111, %c0_112] : memref<2x32x64xf32, #tpu.memory_space<vmem>>, vector<1x32x64xf32>
    %255 = vector.shape_cast %254 : vector<1x32x64xf32> to vector<32x64xf32>
    %cst_113 = arith.constant dense<0.000000e+00> : vector<16x64xf32>
    %256 = tpu.matmul %253, %255, %cst_113 {dimension_numbers = #tpu.dot_dimension_numbers<[1], [0], [0], [1], [0, 0, 1, 1], [], []>} : vector<16x32xf32>, vector<32x64xf32>, vector<16x64xf32> -> vector<16x64xf32>
    %c1_114 = arith.constant 1 : index
    %c0_115 = arith.constant 0 : index
    %c0_116 = arith.constant 0 : index
    %257 = vector.load %arg11[%c1_114, %c0_115, %c0_116] : memref<2x1x64xf32, #tpu.memory_space<vmem>>, vector<1x1x64xf32>
    %258 = vector.shape_cast %257 : vector<1x1x64xf32> to vector<1x64xf32>
    %259 = vector.broadcast %258 : vector<1x64xf32> to vector<16x64xf32>
    %260 = arith.addf %256, %259 : vector<16x64xf32>
    %cst_117 = arith.constant 5.000000e-01 : f32
    %261 = vector.broadcast %cst_117 : f32 to vector<16x64xf32>
    %262 = arith.mulf %261, %260 : vector<16x64xf32>
    %cst_118 = arith.constant 4.471500e-02 : f32
    %263 = vector.broadcast %cst_118 : f32 to vector<16x64xf32>
    %264 = arith.mulf %263, %260 : vector<16x64xf32>
    %265 = arith.mulf %264, %260 : vector<16x64xf32>
    %266 = arith.mulf %265, %260 : vector<16x64xf32>
    %267 = arith.addf %260, %266 : vector<16x64xf32>
    %cst_119 = arith.constant 0.797884583 : f32
    %268 = vector.broadcast %cst_119 : f32 to vector<16x64xf32>
    %269 = arith.mulf %268, %267 : vector<16x64xf32>
    %270 = math.tanh %269 : vector<16x64xf32>
    %cst_120 = arith.constant 1.000000e+00 : f32
    %271 = vector.broadcast %cst_120 : f32 to vector<16x64xf32>
    %272 = arith.addf %271, %270 : vector<16x64xf32>
    %273 = arith.mulf %262, %272 : vector<16x64xf32>
    %c1_121 = arith.constant 1 : index
    %c0_122 = arith.constant 0 : index
    %c0_123 = arith.constant 0 : index
    %274 = vector.load %arg12[%c1_121, %c0_122, %c0_123] : memref<2x64x32xf32, #tpu.memory_space<vmem>>, vector<1x64x32xf32>
    %275 = vector.shape_cast %274 : vector<1x64x32xf32> to vector<64x32xf32>
    %cst_124 = arith.constant dense<0.000000e+00> : vector<16x32xf32>
    %276 = tpu.matmul %273, %275, %cst_124 {dimension_numbers = #tpu.dot_dimension_numbers<[1], [0], [0], [1], [0, 0, 1, 1], [], []>} : vector<16x64xf32>, vector<64x32xf32>, vector<16x32xf32> -> vector<16x32xf32>
    %c1_125 = arith.constant 1 : index
    %c0_126 = arith.constant 0 : index
    %c0_127 = arith.constant 0 : index
    %277 = vector.load %arg13[%c1_125, %c0_126, %c0_127] : memref<2x1x32xf32, #tpu.memory_space<vmem>>, vector<1x1x32xf32>
    %278 = vector.shape_cast %277 : vector<1x1x32xf32> to vector<1x32xf32>
    %279 = vector.broadcast %278 : vector<1x32xf32> to vector<16x32xf32>
    %280 = arith.addf %276, %279 : vector<16x32xf32>
    %281 = arith.addf %280, %253 : vector<16x32xf32>
    %c1_128 = arith.constant 1 : index
    %c0_129 = arith.constant 0 : index
    %c0_130 = arith.constant 0 : index
    %282 = vector.load %arg14[%c1_128, %c0_129, %c0_130] : memref<2x1x32xf32, #tpu.memory_space<vmem>>, vector<1x1x32xf32>
    %283 = vector.shape_cast %282 : vector<1x1x32xf32> to vector<1x32xf32>
    %c1_131 = arith.constant 1 : index
    %c0_132 = arith.constant 0 : index
    %c0_133 = arith.constant 0 : index
    %284 = vector.load %arg15[%c1_131, %c0_132, %c0_133] : memref<2x1x32xf32, #tpu.memory_space<vmem>>, vector<1x1x32xf32>
    %285 = vector.shape_cast %284 : vector<1x1x32xf32> to vector<1x32xf32>
    %cst_134 = arith.constant dense<0.000000e+00> : vector<16xf32>
    %286 = vector.multi_reduction <add>, %281, %cst_134 [1] : vector<16x32xf32> to vector<16xf32>
    %287 = vector.shape_cast %286 : vector<16xf32> to vector<16x1xf32>
    %cst_135 = arith.constant 3.200000e+01 : f32
    %288 = vector.broadcast %cst_135 : f32 to vector<16x1xf32>
    %289 = arith.divf %287, %288 : vector<16x1xf32>
    %290 = vector.broadcast %289 : vector<16x1xf32> to vector<16x32xf32>
    %291 = arith.subf %281, %290 : vector<16x32xf32>
    %292 = arith.mulf %291, %291 : vector<16x32xf32>
    %cst_136 = arith.constant dense<0.000000e+00> : vector<16xf32>
    %293 = vector.multi_reduction <add>, %292, %cst_136 [1] : vector<16x32xf32> to vector<16xf32>
    %294 = vector.shape_cast %293 : vector<16xf32> to vector<16x1xf32>
    %cst_137 = arith.constant 3.200000e+01 : f32
    %295 = vector.broadcast %cst_137 : f32 to vector<16x1xf32>
    %296 = arith.divf %294, %295 : vector<16x1xf32>
    %297 = vector.broadcast %289 : vector<16x1xf32> to vector<16x32xf32>
    %298 = arith.subf %281, %297 : vector<16x32xf32>
    %cst_138 = arith.constant 9.99999996E-13 : f32
    %299 = vector.broadcast %cst_138 : f32 to vector<16x1xf32>
    %300 = arith.addf %296, %299 : vector<16x1xf32>
    %301 = math.rsqrt %300 : vector<16x1xf32>
    %302 = vector.broadcast %301 : vector<16x1xf32> to vector<16x32xf32>
    %303 = arith.mulf %298, %302 : vector<16x32xf32>
    %304 = vector.broadcast %283 : vector<1x32xf32> to vector<16x32xf32>
    %305 = arith.mulf %303, %304 : vector<16x32xf32>
    %306 = vector.broadcast %285 : vector<1x32xf32> to vector<16x32xf32>
    %307 = arith.addf %305, %306 : vector<16x32xf32>
    %308 = vector.extract_strided_slice %307 {offsets = [0, 0], sizes = [1, 32], strides = [1, 1]} : vector<16x32xf32> to vector<1x32xf32>
    %309 = vector.extract_strided_slice %307 {offsets = [8, 0], sizes = [1, 32], strides = [1, 1]} : vector<16x32xf32> to vector<1x32xf32>
    %310 = tpu.concatenate %308, %309 in 0 : vector<1x32xf32>, vector<1x32xf32> -> vector<2x32xf32>
    %c0_139 = arith.constant 0 : index
    %c0_140 = arith.constant 0 : index
    %311 = vector.load %arg16[%c0_139, %c0_140] : memref<32x32xf32, #tpu.memory_space<vmem>>, vector<32x32xf32>
    %cst_141 = arith.constant dense<0.000000e+00> : vector<2x32xf32>
    %312 = tpu.matmul %310, %311, %cst_141 {dimension_numbers = #tpu.dot_dimension_numbers<[1], [0], [0], [1], [0, 0, 1, 1], [], []>} : vector<2x32xf32>, vector<32x32xf32>, vector<2x32xf32> -> vector<2x32xf32>
    %c0_142 = arith.constant 0 : index
    %c0_143 = arith.constant 0 : index
    %313 = vector.load %arg17[%c0_142, %c0_143] : memref<1x32xf32, #tpu.memory_space<vmem>>, vector<1x32xf32>
    %314 = vector.broadcast %313 : vector<1x32xf32> to vector<2x32xf32>
    %315 = arith.addf %312, %314 : vector<2x32xf32>
    %316 = math.tanh %315 : vector<2x32xf32>
    %c0_144 = arith.constant 0 : index
    %c0_145 = arith.constant 0 : index
    %317 = vector.load %arg18[%c0_144, %c0_145] : memref<32x3xf32, #tpu.memory_space<vmem>>, vector<32x3xf32>
    %cst_146 = arith.constant dense<0.000000e+00> : vector<2x3xf32>
    %318 = tpu.matmul %316, %317, %cst_146 {dimension_numbers = #tpu.dot_dimension_numbers<[1], [0], [0], [1], [0, 0, 1, 1], [], []>} : vector<2x32xf32>, vector<32x3xf32>, vector<2x3xf32> -> vector<2x3xf32>
    %c0_147 = arith.constant 0 : index
    %c0_148 = arith.constant 0 : index
    %319 = vector.load %arg19[%c0_147, %c0_148] : memref<1x3xf32, #tpu.memory_space<vmem>>, vector<1x3xf32>
    %320 = vector.broadcast %319 : vector<1x3xf32> to vector<2x3xf32>
    %321 = arith.addf %318, %320 : vector<2x3xf32>
    %c0_149 = arith.constant 0 : index
    %c0_150 = arith.constant 0 : index
    %322 = vector.load %arg20[%c0_149, %c0_150] : memref<2x3xf32, #tpu.memory_space<vmem>>, vector<2x3xf32>
    tpu.vector_store %arg20[%c0_149, %c0_150], %321 {strides = array<i32>} : memref<2x3xf32, #tpu.memory_space<vmem>>, vector<2x3xf32>,
    return
  }
}

</mosaic_0001>

<bundles_post_ra>
// kernel: tpu_custom_call.1
= control target key start
LH: loop header
LB: loop body
LE: loop exit
PB: predicated region body
PF: predicated region fallthrough
CT: control target
= control target key end

     0   :  { %s4421_s0 = inlined_call_operand.hbm [shape: f32[16,32], index: 0, kind: input, shape index: {}]   ;;  %s4422_s1 = inlined_call_operand.hbm [shape: f32[2,1,8], index: 1, kind: input, shape index: {}]   ;;  %s4423_s2 = inlined_call_operand.hbm [shape: f32[1,32], index: 2, kind: input, shape index: {}]   ;;  %s4424_s3 = inlined_call_operand.hbm [shape: f32[1,32], index: 3, kind: input, shape index: {}]   ;;  %s4425_s4 = inlined_call_operand.vmem [shape: f32[2,32,96], index: 4, kind: input, shape index: {}]   ;;  %s4426_s5 = inlined_call_operand.hbm [shape: f32[2,1,96], index: 5, kind: input, shape index: {}]   ;;  %s4427_s6 = inlined_call_operand.vmem [shape: f32[2,32,32], index: 6, kind: input, shape index: {}]   ;;  %s4428_s7 = inlined_call_operand.hbm [shape: f32[2,1,32], index: 7, kind: input, shape index: {}]   ;;  %s4429_s8 = inlined_call_operand.hbm [shape: f32[2,1,32], index: 8, kind: input, shape index: {}]   ;;  %s4430_s9 = inlined_call_operand.hbm [shape: f32[2,1,32], index: 9, kind: input, shape index: {}]   ;;  %s4431_s10 = inlined_call_operand.vmem [shape: f32[2,32,64], index: 10, kind: input, shape index: {}]   ;;  %s4432_s11 = inlined_call_operand.hbm [shape: f32[2,1,64], index: 11, kind: input, shape index: {}]   ;;  %s4433_s12 = inlined_call_operand.vmem [shape: f32[2,64,32], index: 12, kind: input, shape index: {}]   ;;  %s4434_s13 = inlined_call_operand.hbm [shape: f32[2,1,32], index: 13, kind: input, shape index: {}]   ;;  %s4435_s14 = inlined_call_operand.hbm [shape: f32[2,1,32], index: 14, kind: input, shape index: {}]   ;;  %s4436_s15 = inlined_call_operand.hbm [shape: f32[2,1,32], index: 15, kind: input, shape index: {}]   ;;  %s4437_s16 = inlined_call_operand.vmem [shape: f32[32,32], index: 16, kind: input, shape index: {}]   ;;  %s4438_s17 = inlined_call_operand.hbm [shape: f32[1,32], index: 17, kind: input, shape index: {}]   ;;  %s4439_s18 = inlined_call_operand.vmem [shape: f32[32,3], index: 18, kind: input, shape index: {}]   ;;  %s4440_s19 = inlined_call_operand.vmem [shape: f32[1,3], index: 19, kind: input, shape index: {}]   ;;  %s4441_s20 = inlined_call_operand.hbm [shape: f32[2,3], index: 20, kind: output, shape index: {}]  }
   0x1   :  { %4449 = sst [smem:[#allocation32_spill]] %s4421_s0 }
   0x2   :  { %4450 = sst [smem:[#allocation33_spill]] %s4422_s1 }
   0x3   :  { %4451 = sst [smem:[#allocation34_spill]] %s4423_s2 }
   0x4   :  { %4452 = sst [smem:[#allocation35_spill]] %s4424_s3 }
   0x5   :  { %4453 = sst [smem:[#allocation36_spill]] %s4425_s4 }
   0x6   :  { %4454 = sst [smem:[#allocation37_spill]] %s4439_s18 }
   0x7   :  { %4455 = sst [smem:[#allocation38_spill]] %s4440_s19 }
   0x8   :  { %4456 = sst [smem:[#allocation39_spill]] %s4441_s20 }
   0x9   :  { %25 = vsyncpa [#allocation3], 0 }
   0xa   :  { %26 = vsyncpa [#allocation6], 0 }
   0xb   :  { %27 = vsyncpa [#allocation9], 0 }
   0xc   :  { %28 = vsyncpa [#allocation12], 0 }
   0xd   :  { %29 = vsyncpa [#allocation15], 0 }
   0xe   :  { %30 = vsyncpa [#allocation18], 0 }
   0xf   :  { %31 = vsyncpa [#allocation21], 0 }
  0x10   :  { %32 = vsyncpa [#allocation4], 0  ;;  %s3718_s1 = smov [#allocation5]   ;;  %s4457_s2 = sld [smem:[#allocation33_spill]] }
  0x11   :  { %s50_s22 = sshll.u32 %s3718_s1, 4  ;;  %s51_s22 = int_to_ptr.vmem [resolvable:$true] %s50_s22 }
  0x16   :  { %s3394_s25 = scalar_lea.hbm %s4457_s2, 32 }
  0x17   :  { %p3395_p0 = scmp.ne.s32.totalorder %s4457_s2, %s3394_s25  ;;  %p3398_p1 = scmp.lt.u32.totalorder %s3394_s25, %s4457_s2 }
  0x19   :  { %p3400_p2 = pnand %p3398_p1, %p3395_p0 }
  0x1b   :  { %3403 = shalt.err (!%p3400_p2)
}
  0x1c   :  { %s3404_s4 = scalar_lea.vmem %s51_s22, 32  ;;  %p3409_p4 = scmp.lt.s32.totalorder %s51_s22, %s51_s22 }
  0x1d   :  { %p3405_p3 = scmp.ne.s32.totalorder %s51_s22, %s3404_s4  ;;  %p3410_p5 = scmp.lt.s32.totalorder %s3404_s4, %s3404_s4 }
  0x1f   :  { %p3411_p6 = por %p3410_p5, %p3409_p4 }
  0x21   :  { %p3412_p7 = pnand %p3411_p6, %p3405_p3 }
  0x23   :  { %3415 = shalt.err (!%p3412_p7)
}
  0x24   :  { %s3719_s29 = smov 16   ;;  %s3720_s30 = smov 1  }
  0x25   :  { %56 = dma.hbm_to_vmem [thread:$0]  %s4457_s2, 32, %s51_s22, [#allocation6], %s3719_s29, %s3719_s29, %s3720_s30  }
  0x26   :  { %s3721_s1 = smov [#allocation8]   ;;  %s3722_s24 = smov [#allocation11]  }
  0x27   :  { %s73_s23 = sshll.u32 %s3721_s1, 4  ;;  %s98_s25 = sshll.u32 %s3722_s24, 4  ;;  %s74_s23 = int_to_ptr.vmem [resolvable:$true] %s73_s23  ;;  %s99_s25 = int_to_ptr.vmem [resolvable:$true] %s98_s25 }
  0x28   :  { %s4458_s27 = sld [smem:[#allocation35_spill]] }
  0x2e   :  { %s3416_s28 = scalar_lea.hbm %s4458_s27, 16 }
  0x2f   :  { %p3417_p8 = scmp.ne.s32.totalorder %s4458_s27, %s3416_s28  ;;  %p3420_p9 = scmp.lt.u32.totalorder %s3416_s28, %s4458_s27 }
  0x31   :  { %p3422_p10 = pnand %p3420_p9, %p3417_p8 }
  0x33   :  { %3425 = shalt.err (!%p3422_p10)
}
  0x34   :  { %s3426_s22 = scalar_lea.vmem %s74_s23, 16  ;;  %s3430_s2 = scalar_lea.vmem %s74_s23, 32 }
  0x35   :  { %p3427_p11 = scmp.ne.s32.totalorder %s74_s23, %s3426_s22  ;;  %p3431_p12 = scmp.lt.s32.totalorder %s74_s23, %s74_s23 }
  0x36   :  { %p3432_p13 = scmp.lt.s32.totalorder %s3430_s2, %s3426_s22 }
  0x38   :  { %p3433_p0 = por %p3432_p13, %p3431_p12 }
  0x3a   :  { %p3434_p1 = pnand %p3433_p0, %p3427_p11 }
  0x3c   :  { %3437 = shalt.err (!%p3434_p1)
}
  0x3d   :  { %76 = dma.hbm_to_vmem [thread:$0]  %s4458_s27, 16, %s74_s23, [#allocation9]  }
  0x3e   :  { %s3438_s18 = scalar_lea.hbm %s4428_s7, 32 }
  0x3f   :  { %p3439_p2 = scmp.ne.s32.totalorder %s4428_s7, %s3438_s18  ;;  %p3442_p3 = scmp.lt.u32.totalorder %s3438_s18, %s4428_s7 }
  0x41   :  { %p3444_p4 = pnand %p3442_p3, %p3439_p2 }
  0x43   :  { %3447 = shalt.err (!%p3444_p4)
}
  0x44   :  { %s3448_s28 = scalar_lea.vmem %s99_s25, 32  ;;  %p3453_p6 = scmp.lt.s32.totalorder %s99_s25, %s99_s25 }
  0x45   :  { %p3449_p5 = scmp.ne.s32.totalorder %s99_s25, %s3448_s28  ;;  %p3454_p7 = scmp.lt.s32.totalorder %s3448_s28, %s3448_s28 }
  0x47   :  { %p3455_p8 = por %p3454_p7, %p3453_p6 }
  0x49   :  { %p3456_p9 = pnand %p3455_p8, %p3449_p5 }
  0x4b   :  { %3459 = shalt.err (!%p3456_p9)
}
  0x4c   :  { %104 = dma.hbm_to_vmem [thread:$0]  %s4428_s7, 32, %s99_s25, [#allocation12], %s3719_s29, %s3719_s29, %s3720_s30  }
  0x4d   :  { %s3723_s4 = smov [#allocation14]   ;;  %s3724_s2 = smov [#allocation17]  }
  0x4e   :  { %s122_s22 = sshll.u32 %s3723_s4, 4  ;;  %s150_s0 = sshll.u32 %s3724_s2, 4  ;;  %s123_s22 = int_to_ptr.vmem [resolvable:$true] %s122_s22  ;;  %s151_s0 = int_to_ptr.vmem [resolvable:$true] %s150_s0 }
  0x4f   :  { %s3460_s1 = scalar_lea.hbm %s4430_s9, 32 }
  0x50   :  { %p3461_p10 = scmp.ne.s32.totalorder %s4430_s9, %s3460_s1  ;;  %p3464_p11 = scmp.lt.u32.totalorder %s3460_s1, %s4430_s9 }
  0x52   :  { %p3466_p12 = pnand %p3464_p11, %p3461_p10 }
  0x54   :  { %3469 = shalt.err (!%p3466_p12)
}
  0x55   :  { %s3470_s7 = scalar_lea.vmem %s123_s22, 32  ;;  %p3475_p0 = scmp.lt.s32.totalorder %s123_s22, %s123_s22 }
  0x56   :  { %p3471_p13 = scmp.ne.s32.totalorder %s123_s22, %s3470_s7  ;;  %p3476_p1 = scmp.lt.s32.totalorder %s3470_s7, %s3470_s7 }
  0x58   :  { %p3477_p2 = por %p3476_p1, %p3475_p0 }
  0x5a   :  { %p3478_p3 = pnand %p3477_p2, %p3471_p13 }
  0x5c   :  { %3481 = shalt.err (!%p3478_p3)
}
  0x5d   :  { %128 = dma.hbm_to_vmem [thread:$0]  %s4430_s9, 32, %s123_s22, [#allocation15], %s3719_s29, %s3719_s29, %s3720_s30  }
  0x5e   :  { %s3482_s27 = scalar_lea.hbm %s4434_s13, 32 }
  0x5f   :  { %p3483_p4 = scmp.ne.s32.totalorder %s4434_s13, %s3482_s27  ;;  %p3486_p5 = scmp.lt.u32.totalorder %s3482_s27, %s4434_s13 }
  0x61   :  { %p3488_p6 = pnand %p3486_p5, %p3483_p4 }
  0x63   :  { %3491 = shalt.err (!%p3488_p6)
}
  0x64   :  { %s3492_s1 = scalar_lea.vmem %s151_s0, 32  ;;  %p3497_p8 = scmp.lt.s32.totalorder %s151_s0, %s151_s0 }
  0x65   :  { %p3493_p7 = scmp.ne.s32.totalorder %s151_s0, %s3492_s1  ;;  %p3498_p9 = scmp.lt.s32.totalorder %s3492_s1, %s3492_s1 }
  0x67   :  { %p3499_p10 = por %p3498_p9, %p3497_p8 }
  0x69   :  { %p3500_p11 = pnand %p3499_p10, %p3493_p7 }
  0x6b   :  { %3503 = shalt.err (!%p3500_p11)
}
  0x6c   :  { %156 = dma.hbm_to_vmem [thread:$0]  %s4434_s13, 32, %s151_s0, [#allocation18], %s3719_s29, %s3719_s29, %s3720_s30  }
  0x6d   :  { %s3725_s18 = smov [#allocation20]   ;;  %s3726_s24 = smov [#allocation2]  }
  0x6e   :  { %s174_s19 = sshll.u32 %s3725_s18, 4  ;;  %s38_s3 = sshll.u32 %s3726_s24, 4  ;;  %s175_s19 = int_to_ptr.vmem [resolvable:$true] %s174_s19  ;;  %s39_s3 = int_to_ptr.vmem [resolvable:$true] %s38_s3 }
  0x6f   :  { %s3504_s26 = scalar_lea.hbm %s4436_s15, 32 }
  0x70   :  { %p3505_p12 = scmp.ne.s32.totalorder %s4436_s15, %s3504_s26  ;;  %p3508_p13 = scmp.lt.u32.totalorder %s3504_s26, %s4436_s15 }
  0x72   :  { %p3510_p0 = pnand %p3508_p13, %p3505_p12 }
  0x74   :  { %3513 = shalt.err (!%p3510_p0)
}
  0x75   :  { %s3514_s13 = scalar_lea.vmem %s175_s19, 32  ;;  %p3519_p2 = scmp.lt.s32.totalorder %s175_s19, %s175_s19 }
  0x76   :  { %p3515_p1 = scmp.ne.s32.totalorder %s175_s19, %s3514_s13  ;;  %p3520_p3 = scmp.lt.s32.totalorder %s3514_s13, %s3514_s13 }
  0x78   :  { %p3521_p4 = por %p3520_p3, %p3519_p2 }
  0x7a   :  { %p3522_p5 = pnand %p3521_p4, %p3515_p1 }
  0x7c   :  { %3525 = shalt.err (!%p3522_p5)
}
  0x7d   :  { %180 = dma.hbm_to_vmem [thread:$0]  %s4436_s15, 32, %s175_s19, [#allocation21], %s3719_s29, %s3719_s29, %s3720_s30  }
  0x7e   :  { %s4459_s1 = sld [smem:[#allocation32_spill]] }
  0x84   :  { %s3526_s9 = scalar_lea.hbm %s4459_s1, 256 }
  0x85   :  { %p3527_p6 = scmp.ne.s32.totalorder %s4459_s1, %s3526_s9  ;;  %p3530_p7 = scmp.lt.u32.totalorder %s3526_s9, %s4459_s1 }
  0x87   :  { %p3532_p8 = pnand %p3530_p7, %p3527_p6 }
  0x89   :  { %3535 = shalt.err (!%p3532_p8)
}
  0x8a   :  { %s3536_s25 = scalar_lea.vmem %s39_s3, 256  ;;  %p3541_p10 = scmp.lt.s32.totalorder %s39_s3, %s39_s3 }
  0x8b   :  { %p3537_p9 = scmp.ne.s32.totalorder %s39_s3, %s3536_s25  ;;  %p3542_p11 = scmp.lt.s32.totalorder %s3536_s25, %s3536_s25 }
  0x8d   :  { %p3543_p12 = por %p3542_p11, %p3541_p10 }
  0x8f   :  { %p3544_p13 = pnand %p3543_p12, %p3537_p9 }
  0x91   :  { %3547 = shalt.err (!%p3544_p13)
}
  0x92   :  { %s3727_s15 = smov 128   ;;  %s3728_s19 = smov 8  }
  0x93   :  { %44 = dma.hbm_to_vmem [thread:$0]  %s4459_s1, 256, %s39_s3, [#allocation3], %s3727_s15, %s3727_s15, %s3728_s19  }
  0x94   :  { %s3729_s23 = smov [#allocation7]   ;;  %s3730_s4 = smov [#allocation10]  }
  0x95   :  { %s63_s27 = sshll.u32 %s3729_s23, 4  ;;  %s84_s13 = sshll.u32 %s3730_s4, 4  ;;  %s64_s27 = int_to_ptr.vmem [resolvable:$true] %s63_s27  ;;  %s85_s13 = int_to_ptr.vmem [resolvable:$true] %s84_s13 }
  0x96   :  { %s4460_s21 = sld [smem:[#allocation34_spill]] }
  0x9c   :  { %s3548_s20 = scalar_lea.hbm %s4460_s21, 16 }
  0x9d   :  { %p3549_p0 = scmp.ne.s32.totalorder %s4460_s21, %s3548_s20  ;;  %p3552_p1 = scmp.lt.u32.totalorder %s3548_s20, %s4460_s21 }
  0x9f   :  { %p3554_p2 = pnand %p3552_p1, %p3549_p0 }
  0xa1   :  { %3557 = shalt.err (!%p3554_p2)
}
  0xa2   :  { %s3558_s3 = scalar_lea.vmem %s64_s27, 16  ;;  %s3562_s1 = scalar_lea.vmem %s64_s27, 32 }
  0xa3   :  { %p3559_p3 = scmp.ne.s32.totalorder %s64_s27, %s3558_s3  ;;  %p3563_p4 = scmp.lt.s32.totalorder %s64_s27, %s64_s27 }
  0xa4   :  { %p3564_p5 = scmp.lt.s32.totalorder %s3562_s1, %s3558_s3 }
  0xa6   :  { %p3565_p6 = por %p3564_p5, %p3563_p4 }
  0xa8   :  { %p3566_p7 = pnand %p3565_p6, %p3559_p3 }
  0xaa   :  { %3569 = shalt.err (!%p3566_p7)
}
  0xab   :  { %66 = dma.hbm_to_vmem [thread:$0]  %s4460_s21, 16, %s64_s27, [#allocation6]  }
  0xac   :  { %s3570_s26 = scalar_lea.hbm %s4426_s5, 32 }
  0xad   :  { %p3571_p8 = scmp.ne.s32.totalorder %s4426_s5, %s3570_s26  ;;  %p3574_p9 = scmp.lt.u32.totalorder %s3570_s26, %s4426_s5 }
  0xaf   :  { %p3576_p10 = pnand %p3574_p9, %p3571_p8 }
  0xb1   :  { %3579 = shalt.err (!%p3576_p10)
}
  0xb2   :  { %s3580_s2 = scalar_lea.vmem %s85_s13, 32  ;;  %p3585_p12 = scmp.lt.s32.totalorder %s85_s13, %s85_s13 }
  0xb3   :  { %p3581_p11 = scmp.ne.s32.totalorder %s85_s13, %s3580_s2  ;;  %p3586_p13 = scmp.lt.s32.totalorder %s3580_s2, %s3580_s2 }
  0xb5   :  { %p3587_p0 = por %p3586_p13, %p3585_p12 }
  0xb7   :  { %p3588_p1 = pnand %p3587_p0, %p3581_p11 }
  0xb9   :  { %3591 = shalt.err (!%p3588_p1)
}
  0xba   :  { %90 = dma.hbm_to_vmem [thread:$0]  %s4426_s5, 32, %s85_s13, [#allocation9], %s3719_s29, %s3719_s29, %s3720_s30  }
  0xbb   :  { %s3731_s20 = smov [#allocation13]   ;;  %s3732_s22 = smov [#allocation16]  }
  0xbc   :  { %s110_s9 = sshll.u32 %s3731_s20, 4  ;;  %s136_s18 = sshll.u32 %s3732_s22, 4  ;;  %s111_s9 = int_to_ptr.vmem [resolvable:$true] %s110_s9  ;;  %s137_s18 = int_to_ptr.vmem [resolvable:$true] %s136_s18 }
  0xbd   :  { %s3592_s1 = scalar_lea.hbm %s4429_s8, 32 }
  0xbe   :  { %p3593_p2 = scmp.ne.s32.totalorder %s4429_s8, %s3592_s1  ;;  %p3596_p3 = scmp.lt.u32.totalorder %s3592_s1, %s4429_s8 }
  0xc0   :  { %p3598_p4 = pnand %p3596_p3, %p3593_p2 }
  0xc2   :  { %3601 = shalt.err (!%p3598_p4)
}
  0xc3   :  { %s3602_s5 = scalar_lea.vmem %s111_s9, 32  ;;  %p3607_p6 = scmp.lt.s32.totalorder %s111_s9, %s111_s9 }
  0xc4   :  { %p3603_p5 = scmp.ne.s32.totalorder %s111_s9, %s3602_s5  ;;  %p3608_p7 = scmp.lt.s32.totalorder %s3602_s5, %s3602_s5 }
  0xc6   :  { %p3609_p8 = por %p3608_p7, %p3607_p6 }
  0xc8   :  { %p3610_p9 = pnand %p3609_p8, %p3603_p5 }
  0xca   :  { %3613 = shalt.err (!%p3610_p9)
}
  0xcb   :  { %116 = dma.hbm_to_vmem [thread:$0]  %s4429_s8, 32, %s111_s9, [#allocation12], %s3719_s29, %s3719_s29, %s3720_s30  }
  0xcc   :  { %s3614_s4 = scalar_lea.hbm %s4432_s11, 32 }
  0xcd   :  { %p3615_p10 = scmp.ne.s32.totalorder %s4432_s11, %s3614_s4  ;;  %p3618_p11 = scmp.lt.u32.totalorder %s3614_s4, %s4432_s11 }
  0xcf   :  { %p3620_p12 = pnand %p3618_p11, %p3615_p10 }
  0xd1   :  { %3623 = shalt.err (!%p3620_p12)
}
  0xd2   :  { %s3624_s20 = scalar_lea.vmem %s137_s18, 32  ;;  %p3629_p0 = scmp.lt.s32.totalorder %s137_s18, %s137_s18 }
  0xd3   :  { %p3625_p13 = scmp.ne.s32.totalorder %s137_s18, %s3624_s20  ;;  %p3630_p1 = scmp.lt.s32.totalorder %s3624_s20, %s3624_s20 }
  0xd5   :  { %p3631_p2 = por %p3630_p1, %p3629_p0 }
  0xd7   :  { %p3632_p3 = pnand %p3631_p2, %p3625_p13 }
  0xd9   :  { %3635 = shalt.err (!%p3632_p3)
}
  0xda   :  { %142 = dma.hbm_to_vmem [thread:$0]  %s4432_s11, 32, %s137_s18, [#allocation15], %s3719_s29, %s3719_s29, %s3720_s30  }
  0xdb   :  { %s3733_s22 = smov [#allocation19]   ;;  %s3734_s3 = smov [#allocation22]  }
  0xdc   :  { %s162_s24 = sshll.u32 %s3733_s22, 4  ;;  %s189_s1 = sshll.u32 %s3734_s3, 4  ;;  %s163_s24 = int_to_ptr.vmem [resolvable:$true] %s162_s24  ;;  %s190_s1 = int_to_ptr.vmem [resolvable:$true] %s189_s1 }
  0xdd   :  { %s3636_s15 = scalar_lea.hbm %s4435_s14, 32 }
  0xde   :  { %p3637_p4 = scmp.ne.s32.totalorder %s4435_s14, %s3636_s15  ;;  %p3640_p5 = scmp.lt.u32.totalorder %s3636_s15, %s4435_s14 }
  0xe0   :  { %p3642_p6 = pnand %p3640_p5, %p3637_p4 }
  0xe2   :  { %3645 = shalt.err (!%p3642_p6)
}
  0xe3   :  { %s3646_s11 = scalar_lea.vmem %s163_s24, 32  ;;  %p3651_p8 = scmp.lt.s32.totalorder %s163_s24, %s163_s24 }
  0xe4   :  { %p3647_p7 = scmp.ne.s32.totalorder %s163_s24, %s3646_s11  ;;  %p3652_p9 = scmp.lt.s32.totalorder %s3646_s11, %s3646_s11 }
  0xe6   :  { %p3653_p10 = por %p3652_p9, %p3651_p8 }
  0xe8   :  { %p3654_p11 = pnand %p3653_p10, %p3647_p7 }
  0xea   :  { %3657 = shalt.err (!%p3654_p11)
}
  0xeb   :  { %168 = dma.hbm_to_vmem [thread:$0]  %s4435_s14, 32, %s163_s24, [#allocation18], %s3719_s29, %s3719_s29, %s3720_s30  }
  0xec   :  { %s3658_s0 = scalar_lea.hbm %s4438_s17, 16 }
  0xed   :  { %p3659_p12 = scmp.ne.s32.totalorder %s4438_s17, %s3658_s0  ;;  %p3662_p13 = scmp.lt.u32.totalorder %s3658_s0, %s4438_s17 }
  0xef   :  { %p3664_p0 = pnand %p3662_p13, %p3659_p12 }
  0xf1   :  { %3667 = shalt.err (!%p3664_p0)
}
  0xf2   :  { %s3668_s8 = scalar_lea.vmem %s190_s1, 16  ;;  %s3672_s9 = scalar_lea.vmem %s190_s1, 32 }
  0xf3   :  { %p3669_p1 = scmp.ne.s32.totalorder %s190_s1, %s3668_s8  ;;  %p3673_p2 = scmp.lt.s32.totalorder %s190_s1, %s190_s1 }
  0xf4   :  { %p3674_p3 = scmp.lt.s32.totalorder %s3672_s9, %s3668_s8 }
  0xf6   :  { %p3675_p4 = por %p3674_p3, %p3673_p2 }
  0xf8   :  { %p3676_p5 = pnand %p3675_p4, %p3669_p1 }
  0xfa   :  { %3679 = shalt.err (!%p3676_p5)
}
  0xfb   :  { %192 = dma.hbm_to_vmem [thread:$0]  %s4438_s17, 16, %s190_s1, [#allocation21]  }
  0xfc   :  { %3702 = dma.done.wait [#allocation3], 256  }
  0xfd   :  { %3703 = vsyncadd [#allocation3], 4294967040 }
  0xfe   :  { %3704 = dma.done.wait [#allocation6], 48  }
  0xff   :  { %3705 = vsyncadd [#allocation6], 4294967248 }
 0x100   :  { %3706 = dma.done.wait [#allocation9], 48  }
 0x101   :  { %3707 = vsyncadd [#allocation9], 4294967248 }
 0x102   :  { %3708 = dma.done.wait [#allocation12], 64  }
 0x103   :  { %3709 = vsyncadd [#allocation12], 4294967232 }
 0x104   :  { %3710 = dma.done.wait [#allocation15], 64  }
 0x105   :  { %3711 = vsyncadd [#allocation15], 4294967232 }
 0x106   :  { %3712 = dma.done.wait [#allocation18], 64  }
 0x107   :  { %3713 = vsyncadd [#allocation18], 4294967232 }
 0x108   :  { %3714 = dma.done.wait [#allocation21], 48  }
 0x109   :  { %3715 = vsyncadd [#allocation21], 4294967248  ;;  %vm240_vm0 = vcmask 261120   ;;  %v236_v0 = vld [vmem:[#allocation2] sm:$0xff]  ;;  %v237_v1 = vld [vmem:[#allocation2 + $0x8] sm:$0xff]  ;;  %s4461_s24 = sld [smem:[#allocation36_spill]] }
 0x10a   :  { %v241_v2 = vsel %vm240_vm0, %v236_v0, 0.0  ;;  %v244_v3 = vsel %vm240_vm0, %v237_v1, 0.0  ;;  %v2826_v27 = vld [vmem:[#allocation7] ss:$0 sm:$0xff]  ;;  %v2827_v29 = vld [vmem:[#allocation8] ss:$0 sm:$0xff] }
 0x10b   :  { %242 = vadd.xlane.f32.xlu0 %v241_v2  ;;  %v3735_v36 = vmov 0.0   ;;  %vm3736_vm1 = vmmov 0   ;;  %v2828_v37 = vld [vmem:[#allocation10] ss:$0 sm:$0xff]  ;;  %s3737_s5 = smov 96   ;;  %vm381_vm2 = vcmask 130048  }
 0x10c   :  { %3019 = vmatprep.subr.mxu1 %v3735_v36  ;;  %3021 = vmatprep.mubr.msk.f32.mxu1 %vm3736_vm1, %v3735_v36  ;;  %v4082_v45 = vld [vmem:[#allocation5] ss:$0 sm:$0xff]  ;;  %vm549_vm3 = vcmask 64512   ;;  %v4085_v50 = vld [vmem:[#allocation5 + $0x1] ss:$0 sm:$0xff]  ;;  %s3738_s13 = smov 64  }
 0x10d   :  { %s3739_s26 = smov 80   ;;  %s3740_s11 = smov 112   ;;  %vm1331_vm4 = vcmask 523264   ;;  %vm2632_vm5 = vcmask 1040384   ;;  %vm2803_vm6 = vcmask 17408  }
 0x10e   :  { %s3741_s18 = smov 48   ;;  %s4462_s0 = sld [smem:[#allocation37_spill]] }
 0x10f   :  { %245 = vadd.xlane.f32.xlu0 %v244_v3  ;;  %v286_v14 = vld [vmem:[%s4461_s24] sm:$0xff]  ;;  %v287_v15 = vld [vmem:[%s4461_s24 + $0x8] sm:$0xff]  ;;  %v288_v16 = vld [vmem:[%s4461_s24 + $0x10] sm:$0xff]  ;;  %s4463_s30 = sld [smem:[#allocation38_spill]]  ;;  %s3743_s17 = smov [#allocation23]  }
 0x110   :  { %v3214_v17 = vpack.c.bf16 %v287_v15, %v286_v14  ;;  %v289_v18 = vld [vmem:[%s4461_s24 + $0x18] sm:$0xff]  ;;  %s2811_s22 = sshll.u32 %s3743_s17, 4  ;;  %s2812_s22 = int_to_ptr.vmem [resolvable:$true] %s2811_s22 }
 0x111   :  { %v3218_v19 = vpack.c.bf16 %v289_v18, %v288_v16  ;;  %s3680_s3 = scalar_lea.vmem %s2812_s22, 32  ;;  %p3685_p7 = scmp.lt.s32.totalorder %s2812_s22, %s2812_s22 }
 0x112   :  { %3215 = vmatprep.subr.bf16.mxu0 %v3214_v17  ;;  %p3681_p6 = scmp.ne.s32.totalorder %s2812_s22, %s3680_s3  ;;  %p3686_p8 = scmp.lt.s32.totalorder %s3680_s3, %s3680_s3 }
 0x113   :  { %3217 = vmatpush3.bf16.msra.mxu0 %v3214_v17 }
 0x114   :  { %3219 = vmatprep.subr.bf16.mxu0 %v3218_v19  ;;  %p3687_p9 = por %p3686_p8, %p3685_p7 }
 0x116   :  { %p3688_p10 = pnand %p3687_p9, %p3681_p6 }
 0x117   :  { %3221 = vmatpush3.bf16.msra.mxu0 %v3218_v19 }
 0x118   :  { %3029 = vmatprep.subr.mxu0 %v3735_v36 }
 0x198   :  { %v243_v4 = vpop.xlane.xlu0 %242 }
 0x199   :  { %v248_v5 = vmul.f32 0.03125, %v243_v4 }
 0x19b   :  { %v250_v6 = vsub.f32 %v236_v0, %v248_v5 }
 0x19c   :  { %v246_v7 = vpop.xlane.xlu0 %245 }
 0x19d   :  { %v249_v8 = vmul.f32 0.03125, %v246_v7  ;;  %v252_v9 = vmul.f32 %v250_v6, %v250_v6 }
 0x19f   :  { %v251_v10 = vsub.f32 %v237_v1, %v249_v8  ;;  %v254_v11 = vsel %vm240_vm0, %v252_v9, 0.0 }
 0x1a0   :  { %255 = vadd.xlane.f32.xlu1 %v254_v11 }
 0x1a1   :  { %v253_v12 = vmul.f32 %v251_v10, %v251_v10 }
 0x1a3   :  { %v257_v13 = vsel %vm240_vm0, %v253_v12, 0.0 }
 0x1a4   :  { %258 = vadd.xlane.f32.xlu1 %v257_v13 }
 0x22d   :  { %v256_v20 = vpop.xlane.xlu1 %255 }
 0x22e   :  { %v260_v21 = vmul.f32 0.03125, %v256_v20 }
 0x230   :  { %v262_v22 = vadd.f32 1e-12, %v260_v21 }
 0x231   :  { %v259_v23 = vpop.xlane.xlu1 %258 }
 0x232   :  { %3332 = vrsqrt.f32 %v262_v22  ;;  %v261_v24 = vmul.f32 0.03125, %v259_v23 }
 0x234   :  { %v263_v25 = vadd.f32 1e-12, %v261_v24 }
 0x236   :  { %3334 = vrsqrt.f32 %v263_v25 }
 0x23c   :  { %v3333_v26 = vpop.eup %3332 }
 0x23d   :  { %v266_v28 = vmul.f32 %v3333_v26, %v250_v6 }
 0x23f   :  { %v274_v30 = vmul.f32 %v2826_v27, %v266_v28 }
 0x240   :  { %v3335_v31 = vpop.eup %3334 }
 0x241   :  { %v267_v32 = vmul.f32 %v3335_v31, %v251_v10  ;;  %v4048_v33 = vadd.f32 %v2827_v29, %v274_v30 }
 0x243   :  { %v275_v34 = vmul.f32 %v2826_v27, %v267_v32  ;;  %3016 = vmatprep.mubr.msk.f32.mxu0 %vm240_vm0, %v4048_v33 }
 0x245   :  { %v4052_v35 = vadd.f32 %v2827_v29, %v275_v34 }
 0x247   :  { %3017 = vmatmul.mubr.msk.f32.vlgmr.msra.gmra.mrb[0].mxu0 %vm240_vm0, %v4052_v35 }
 0x248   :  { %3031 = vmatprep.mubr.msk.f32.mxu0 %vm3736_vm1, %v3735_v36 }
 0x31a   :  { %v3018_v38 = vpop.f32.mrb[0].mxu0 }
 0x31b   :  { %v4062_v39 = vadd.f32 %v3018_v38, %v2828_v37  ;;  %v369_v40 = vpop.f32.mrb[1].mxu0 }
 0x31c   :  { %v4064_v41 = vadd.f32 %v2828_v37, %v369_v40 }
 0x31d   :  { %457 = vrot.lane.b32.xlu1 %v4062_v39, %s3737_s5 }
 0x31e   :  { %379 = vrot.lane.b32.xlu0 %v4064_v41, %s3737_s5 }
 0x38f   :  { %v458_v43 = vpop.permute.xlu1 %457 }
 0x390   :  { %v380_v42 = vpop.permute.xlu0 %379 }
 0x391   :  { %3020 = vmatpush3.xpose.msk.msra.mxu1 %vm381_vm2, %v380_v42 }
 0x392   :  { %3024 = vmatprep.subr.mxu1 %v3735_v36 }
 0x394   :  { %3022 = vmatmul.mubr.msk.f32.vlgmr.msra.gmra.mrb[0].mxu1 %vm381_vm2, %v4064_v41 }
 0x395   :  { %3025 = vmatpush3.xpose.msk.msra.mxu1 %vm381_vm2, %v458_v43  ;;  %3026 = vmatprep.mubr.msk.f32.mxu1 %vm3736_vm1, %v3735_v36 }
 0x396   :  { %3034 = vmatprep.subr.mxu1 %v3735_v36 }
 0x398   :  { %3027 = vmatmul.mubr.msk.f32.vlgmr.msra.gmra.mrb[2].mxu1 %vm381_vm2, %v4062_v39 }
 0x399   :  { %3036 = vmatprep.mubr.msk.f32.mxu1 %vm3736_vm1, %v3735_v36 }
 0x467   :  { %v452_v44 = vpop.f32.mrb[0].mxu1 }
 0x468   :  { %v533_v46 = vmul.f32 0.25, %v452_v44  ;;  %v3023_v47 = vpop.f32.mrb[1].mxu1 }
 0x46a   :  { %v547_v48 = vadd.f32 %v4082_v45, %v533_v46 }
 0x46b   :  { %v529_v49 = vpop.f32.mrb[2].mxu1 }
 0x46c   :  { %v534_v51 = vmul.f32 0.25, %v529_v49  ;;  %v3028_v52 = vpop.f32.mrb[3].mxu1  ;;  %v550_v53 = vsel %vm549_vm3, %v547_v48, -inf }
 0x46d   :  { %551 = vmax.xlane.f32.xlu1 %v550_v53  ;;  %v1068_v52 = vld [vmem:[%s4427_s6] sm:$0xff] }
 0x46e   :  { %v548_v54 = vadd.f32 %v4085_v50, %v534_v51 }
 0x470   :  { %v553_v55 = vsel %vm549_vm3, %v548_v54, -inf }
 0x471   :  { %554 = vmax.xlane.f32.xlu0 %v553_v55  ;;  %v1071_v55 = vld [vmem:[%s4427_s6 + $0x18] sm:$0xff] }
 0x47e   :  { %648 = vrot.lane.b32.xlu1 %v4062_v39, %s3738_s13 }
 0x482   :  { %726 = vrot.lane.b32.xlu1 %v4064_v41, %s3739_s26 }
 0x486   :  { %804 = vrot.lane.b32.xlu1 %v4062_v39, %s3739_s26 }
 0x487   :  { %572 = vrot.lane.b32.xlu0 %v4064_v41, %s3738_s13 }
 0x4fa   :  { %v552_v56 = vpop.xlane.xlu1 %551 }
 0x4fb   :  { %v556_v57 = vsub.f32 %v547_v48, %v552_v56 }
 0x4fd   :  { %v558_v58 = vmul.f32 1.442695, %v556_v57 }
 0x4fe   :  { %v649_v59 = vpop.permute.xlu1 %648  ;;  %v555_v60 = vpop.xlane.xlu0 %554 }
 0x4ff   :  { %3336 = vpow2.f32 %v558_v58  ;;  %v557_v61 = vsub.f32 %v548_v54, %v555_v60  ;;  %3035 = vmatpush3.msra.mxu1 %v649_v59  ;;  %v1070_v54 = vld [vmem:[%s4427_s6 + $0x10] sm:$0xff] }
 0x500   :  { %3044 = vmatprep.subr.mxu1 %v3735_v36  ;;  %v3226_v56 = vpack.c.bf16 %v1071_v55, %v1070_v54  ;;  %v1322_v54 = vld [vmem:[%s4433_s12 + $0x30] sm:$0xff]  ;;  %v1323_v55 = vld [vmem:[%s4433_s12 + $0x38] sm:$0xff] }
 0x501   :  { %v560_v62 = vmul.f32 1.442695, %v557_v61 }
 0x502   :  { %v573_v63 = vpop.permute.xlu0 %572  ;;  %v727_v4 = vpop.permute.xlu1 %726 }
 0x503   :  { %3338 = vpow2.f32 %v560_v62  ;;  %3030 = vmatpush3.msra.mxu0 %v573_v63 }
 0x504   :  { %3039 = vmatprep.subr.mxu0 %v3735_v36 }
 0x506   :  { %v805_v5 = vpop.permute.xlu1 %804 }
 0x509   :  { %v3337_v0 = vpop.eup %3336 }
 0x50a   :  { %v562_v1 = vsel %vm549_vm3, %v3337_v0, 0.0 }
 0x50b   :  { %563 = vadd.xlane.f32.xlu0 %v562_v1  ;;  %v2845_v1 = vld [vmem:[#allocation11] ss:$0 sm:$0xff] }
 0x50d   :  { %v3339_v2 = vpop.eup %3338 }
 0x50e   :  { %v565_v3 = vsel %vm549_vm3, %v3339_v2, 0.0 }
 0x50f   :  { %566 = vadd.xlane.f32.xlu1 %v565_v3 }
 0x520   :  { %802 = vrot.lane.b32.xlu1 %v4062_v39, %s3740_s11 }
 0x521   :  { %724 = vrot.lane.b32.xlu0 %v4064_v41, %s3740_s11 }
 0x598   :  { %v564_v6 = vpop.xlane.xlu0 %563 }
 0x599   :  { %3340 = vrcp.f32 %v564_v6 }
 0x59c   :  { %v567_v7 = vpop.xlane.xlu1 %566  ;;  %v725_v12 = vpop.permute.xlu0 %724 }
 0x59d   :  { %3342 = vrcp.f32 %v567_v7 }
 0x5a0   :  { %v803_v13 = vpop.permute.xlu1 %802 }
 0x5a3   :  { %v3341_v8 = vpop.eup %3340 }
 0x5a4   :  { %v570_v9 = vmul.f32 %v3341_v8, %v3337_v0 }
 0x5a6   :  { %3032 = vmatmul.mubr.msk.f32.vlgmr.msra.gmra.mrb[2].mxu0 %vm549_vm3, %v570_v9 }
 0x5a7   :  { %v3343_v10 = vpop.eup %3342  ;;  %3040 = vmatpush3.xpose.msk.msra.mxu0 %vm381_vm2, %v727_v4  ;;  %3041 = vmatprep.mubr.msk.f32.mxu0 %vm3736_vm1, %v3735_v36 }
 0x5a8   :  { %v571_v11 = vmul.f32 %v3343_v10, %v3339_v2  ;;  %3049 = vmatprep.subr.mxu0 %v3735_v36 }
 0x5aa   :  { %3037 = vmatmul.mubr.msk.f32.vlgmr.msra.gmra.mrb[4].mxu1 %vm549_vm3, %v571_v11  ;;  %3042 = vmatmul.mubr.msk.f32.vlgmr.msra.gmra.mrb[4].mxu0 %vm381_vm2, %v725_v12 }
 0x5ab   :  { %3045 = vmatpush3.xpose.msk.msra.mxu1 %vm381_vm2, %v805_v5  ;;  %3046 = vmatprep.mubr.msk.f32.mxu1 %vm3736_vm1, %v3735_v36 }
 0x5ac   :  { %3054 = vmatprep.subr.mxu1 %v3735_v36  ;;  %3051 = vmatprep.mubr.msk.f32.mxu0 %vm3736_vm1, %v3735_v36 }
 0x5ae   :  { %3047 = vmatmul.mubr.msk.f32.vlgmr.msra.gmra.mrb[6].mxu1 %vm381_vm2, %v803_v13 }
 0x5af   :  { %3056 = vmatprep.mubr.msk.f32.mxu1 %vm3736_vm1, %v3735_v36 }
 0x679   :  { %v4122_v14 = vpop.f32.mrb[2].mxu0 }
 0x67a   :  { %v3033_v15 = vpop.f32.mrb[3].mxu0 }
 0x67d   :  { %v4124_v16 = vpop.f32.mrb[4].mxu1  ;;  %v798_v17 = vpop.f32.mrb[4].mxu0 }
 0x67e   :  { %v880_v18 = vmul.f32 0.25, %v798_v17  ;;  %v3038_v19 = vpop.f32.mrb[5].mxu1  ;;  %v3043_v20 = vpop.f32.mrb[5].mxu0 }
 0x67f   :  { %v1207_v19 = vld [vmem:[%s4431_s10 + $0x8] sm:$0xff] }
 0x680   :  { %v882_v21 = vadd.f32 %v4082_v45, %v880_v18 }
 0x681   :  { %v876_v22 = vpop.f32.mrb[6].mxu1 }
 0x682   :  { %v881_v23 = vmul.f32 0.25, %v876_v22  ;;  %v3048_v24 = vpop.f32.mrb[7].mxu1  ;;  %v884_v25 = vsel %vm549_vm3, %v882_v21, -inf  ;;  %v1209_v22 = vld [vmem:[%s4431_s10 + $0x18] sm:$0xff] }
 0x683   :  { %885 = vmax.xlane.f32.xlu0 %v884_v25 }
 0x684   :  { %v883_v26 = vadd.f32 %v4085_v50, %v881_v23 }
 0x686   :  { %v887_v27 = vsel %vm549_vm3, %v883_v26, -inf }
 0x687   :  { %888 = vmax.xlane.f32.xlu1 %v887_v27 }
 0x698   :  { %982 = vrot.lane.b32.xlu1 %v4062_v39, %s3741_s18 }
 0x710   :  { %v886_v28 = vpop.xlane.xlu0 %885 }
 0x711   :  { %v890_v29 = vsub.f32 %v882_v21, %v886_v28  ;;  %v1208_v21 = vld [vmem:[%s4431_s10 + $0x10] sm:$0xff] }
 0x712   :  { %v3234_v23 = vpack.c.bf16 %v1209_v22, %v1208_v21 }
 0x713   :  { %v892_v30 = vmul.f32 1.442695, %v890_v29 }
 0x714   :  { %v889_v31 = vpop.xlane.xlu1 %888 }
 0x715   :  { %3344 = vpow2.f32 %v892_v30  ;;  %v891_v32 = vsub.f32 %v883_v26, %v889_v31  ;;  %v2848_v31 = vld [vmem:[#allocation13] ss:$0 sm:$0xff] }
 0x717   :  { %v894_v34 = vmul.f32 1.442695, %v891_v32 }
 0x718   :  { %v983_v37 = vpop.permute.xlu1 %982 }
 0x719   :  { %3346 = vpow2.f32 %v894_v34  ;;  %3055 = vmatpush3.msra.mxu1 %v983_v37  ;;  %v2849_v34 = vld [vmem:[#allocation14] ss:$0 sm:$0xff] }
 0x71f   :  { %v3345_v38 = vpop.eup %3344 }
 0x720   :  { %v896_v40 = vsel %vm549_vm3, %v3345_v38, 0.0 }
 0x721   :  { %897 = vadd.xlane.f32.xlu0 %v896_v40 }
 0x723   :  { %v3347_v42 = vpop.eup %3346 }
 0x724   :  { %v899_v43 = vsel %vm549_vm3, %v3347_v42, 0.0 }
 0x725   :  { %900 = vadd.xlane.f32.xlu0 %v899_v43 }
 0x73b   :  { %906 = vrot.lane.b32.xlu0 %v4064_v41, %s3741_s18  ;;  %v1069_v41 = vld [vmem:[%s4427_s6 + $0x8] sm:$0xff] }
 0x73c   :  { %v3222_v53 = vpack.c.bf16 %v1069_v41, %v1068_v52  ;;  %v1320_v52 = vld [vmem:[%s4433_s12 + $0x20] sm:$0xff]  ;;  %v1321_v41 = vld [vmem:[%s4433_s12 + $0x28] sm:$0xff] }
 0x7ae   :  { %v898_v39 = vpop.xlane.xlu0 %897 }
 0x7af   :  { %3348 = vrcp.f32 %v898_v39 }
 0x7b2   :  { %v901_v44 = vpop.xlane.xlu0 %900 }
 0x7b3   :  { %3350 = vrcp.f32 %v901_v44  ;;  %v1316_v44 = vld [vmem:[%s4433_s12] sm:$0xff] }
 0x7b6   :  { %v907_v46 = vpop.permute.xlu0 %906 }
 0x7b7   :  { %3050 = vmatpush3.msra.mxu0 %v907_v46  ;;  %v1317_v46 = vld [vmem:[%s4433_s12 + $0x8] sm:$0xff] }
 0x7b8   :  { %3223 = vmatprep.subr.bf16.mxu0 %v3222_v53 }
 0x7b9   :  { %v3349_v47 = vpop.eup %3348 }
 0x7ba   :  { %v904_v48 = vmul.f32 %v3349_v47, %v3345_v38  ;;  %v3238_v47 = vpack.c.bf16 %v1317_v46, %v1316_v44 }
 0x7bc   :  { %3052 = vmatmul.mubr.msk.f32.vlgmr.msra.gmra.mrb[6].mxu0 %vm549_vm3, %v904_v48  ;;  %v1318_v48 = vld [vmem:[%s4433_s12 + $0x10] sm:$0xff] }
 0x7bd   :  { %v3351_v49 = vpop.eup %3350  ;;  %3225 = vmatpush3.bf16.msra.mxu0 %v3222_v53  ;;  %v3246_v53 = vpack.c.bf16 %v1321_v41, %v1320_v52  ;;  %v2856_v52 = vld [vmem:[#allocation19] ss:$0 sm:$0xff] }
 0x7be   :  { %v905_v51 = vmul.f32 %v3351_v49, %v3347_v42  ;;  %3227 = vmatprep.subr.bf16.mxu0 %v3226_v56  ;;  %v1319_v49 = vld [vmem:[%s4433_s12 + $0x18] sm:$0xff] }
 0x7c0   :  { %3057 = vmatmul.mubr.msk.f32.vlgmr.msra.gmra.mrb[8].mxu1 %vm549_vm3, %v905_v51  ;;  %v3242_v51 = vpack.c.bf16 %v1319_v49, %v1318_v48 }
 0x7c1   :  { %3229 = vmatpush3.bf16.msra.mxu0 %v3226_v56  ;;  %v3250_v56 = vpack.c.bf16 %v1323_v55, %v1322_v54  ;;  %v2857_v55 = vld [vmem:[#allocation20] ss:$0 sm:$0xff] }
 0x7c2   :  { %3239 = vmatprep.subr.bf16.mxu0 %v3238_v47 }
 0x88f   :  { %v978_v57 = vpop.f32.mrb[6].mxu0 }
 0x890   :  { %1060 = vrot.lane.b32.xlu1 %v978_v57, %s3719_s29  ;;  %v3053_v58 = vpop.f32.mrb[7].mxu0  ;;  %v2850_v57 = vld [vmem:[#allocation16] ss:$0 sm:$0xff] }
 0x893   :  { %v1054_v59 = vpop.f32.mrb[8].mxu1 }
 0x894   :  { %1062 = vrot.lane.b32.xlu1 %v1054_v59, %s3719_s29  ;;  %v3058_v60 = vpop.f32.mrb[9].mxu1 }
 0x902   :  { %v1061_v61 = vpop.permute.xlu1 %1060 }
 0x903   :  { %v1066_v62 = vsel %vm381_vm2, %v4122_v14, %v1061_v61 }
 0x904   :  { %3067 = vmatprep.mubr.msk.f32.mxu0 %vm240_vm0, %v1066_v62 }
 0x906   :  { %v1063_v63 = vpop.permute.xlu1 %1062 }
 0x907   :  { %v1067_v0 = vsel %vm381_vm2, %v4124_v16, %v1063_v63 }
 0x908   :  { %3068 = vmatmul.mubr.msk.f32.vlgmr.msra.gmra.mrb[8].mxu0 %vm240_vm0, %v1067_v0 }
 0x909   :  { %3241 = vmatpush3.bf16.msra.mxu0 %v3238_v47 }
 0x90a   :  { %3243 = vmatprep.subr.bf16.mxu0 %v3242_v51 }
 0x90d   :  { %3245 = vmatpush3.bf16.msra.mxu0 %v3242_v51 }
 0x90e   :  { %3247 = vmatprep.subr.bf16.mxu0 %v3246_v53 }
 0x911   :  { %3249 = vmatpush3.bf16.msra.mxu0 %v3246_v53 }
 0x912   :  { %3251 = vmatprep.subr.bf16.mxu0 %v3250_v56 }
 0x915   :  { %3253 = vmatpush3.bf16.msra.mxu0 %v3250_v56 }
 0x916   :  { %3121 = vmatprep.subr.mxu0 %v3735_v36 }
 0x9db   :  { %v3069_v2 = vpop.f32.mrb[8].mxu0 }
 0x9dc   :  { %v1157_v3 = vadd.f32 %v3069_v2, %v2845_v1  ;;  %v1151_v4 = vpop.f32.mrb[9].mxu0 }
 0x9dd   :  { %v1152_v5 = vadd.f32 %v2845_v1, %v1151_v4 }
 0x9de   :  { %v1161_v6 = vadd.f32 %v1157_v3, %v4052_v35 }
 0x9df   :  { %v1160_v7 = vadd.f32 %v1152_v5, %v4048_v33  ;;  %v1206_v33 = vld [vmem:[%s4431_s10] sm:$0xff] }
 0x9e0   :  { %v1167_v8 = vsel %vm240_vm0, %v1161_v6, 0.0  ;;  %v3230_v20 = vpack.c.bf16 %v1207_v19, %v1206_v33 }
 0x9e1   :  { %1168 = vadd.xlane.f32.xlu1 %v1167_v8  ;;  %v1164_v9 = vsel %vm240_vm0, %v1160_v7, 0.0 }
 0x9e2   :  { %1165 = vadd.xlane.f32.xlu0 %v1164_v9  ;;  %3231 = vmatprep.subr.bf16.mxu1 %v3230_v20 }
 0x9e3   :  { %3233 = vmatpush3.bf16.msra.mxu1 %v3230_v20 }
 0x9e4   :  { %3235 = vmatprep.subr.bf16.mxu1 %v3234_v23 }
 0x9e7   :  { %3237 = vmatpush3.bf16.msra.mxu1 %v3234_v23 }
 0xa6e   :  { %v1169_v10 = vpop.xlane.xlu1 %1168 }
 0xa6f   :  { %v1171_v11 = vmul.f32 0.03125, %v1169_v10  ;;  %v1166_v12 = vpop.xlane.xlu0 %1165 }
 0xa70   :  { %v1170_v13 = vmul.f32 0.03125, %v1166_v12 }
 0xa71   :  { %v1173_v14 = vsub.f32 %v1161_v6, %v1171_v11 }
 0xa72   :  { %v1172_v15 = vsub.f32 %v1160_v7, %v1170_v13 }
 0xa73   :  { %v1175_v18 = vmul.f32 %v1173_v14, %v1173_v14 }
 0xa74   :  { %v1174_v16 = vmul.f32 %v1172_v15, %v1172_v15 }
 0xa75   :  { %v1179_v35 = vsel %vm240_vm0, %v1175_v18, 0.0 }
 0xa76   :  { %v1176_v17 = vsel %vm240_vm0, %v1174_v16, 0.0  ;;  %v2853_v16 = vld [vmem:[#allocation17] ss:$0 sm:$0xff] }
 0xa77   :  { %1177 = vadd.xlane.f32.xlu0 %v1176_v17 }
 0xa7b   :  { %1180 = vadd.xlane.f32.xlu0 %v1179_v35 }
 0xb04   :  { %v1178_v24 = vpop.xlane.xlu0 %1177 }
 0xb05   :  { %v1182_v25 = vmul.f32 0.03125, %v1178_v24 }
 0xb07   :  { %v1184_v26 = vadd.f32 1e-12, %v1182_v25 }
 0xb08   :  { %v1181_v27 = vpop.xlane.xlu0 %1180 }
 0xb09   :  { %3352 = vrsqrt.f32 %v1184_v26  ;;  %v1183_v28 = vmul.f32 0.03125, %v1181_v27 }
 0xb0b   :  { %v1185_v29 = vadd.f32 1e-12, %v1183_v28 }
 0xb0d   :  { %3354 = vrsqrt.f32 %v1185_v29 }
 0xb13   :  { %v3353_v30 = vpop.eup %3352 }
 0xb14   :  { %v1188_v32 = vmul.f32 %v3353_v30, %v1172_v15 }
 0xb16   :  { %v1196_v37 = vmul.f32 %v2848_v31, %v1188_v32 }
 0xb17   :  { %v3355_v38 = vpop.eup %3354 }
 0xb18   :  { %v1189_v40 = vmul.f32 %v3355_v38, %v1173_v14  ;;  %v1204_v42 = vadd.f32 %v2849_v34, %v1196_v37  ;;  %v2859_v37 = vld [vmem:[%s4461_s24 + $0x28] sm:$0xff] }
 0xb1a   :  { %v1197_v43 = vmul.f32 %v2848_v31, %v1189_v40  ;;  %3078 = vmatprep.mubr.msk.f32.mxu1 %vm240_vm0, %v1204_v42  ;;  %v2860_v40 = vld [vmem:[%s4461_s24 + $0x30] sm:$0xff] }
 0xb1c   :  { %v1205_v39 = vadd.f32 %v2849_v34, %v1197_v43  ;;  %v2858_v34 = vld [vmem:[%s4461_s24 + $0x20] sm:$0xff] }
 0xb1d   :  { %v3254_v38 = vpack.c.bf16 %v2859_v37, %v2858_v34 }
 0xb1e   :  { %3079 = vmatmul.mubr.msk.f32.vlgmr.msra.gmra.mrb[10].mxu1 %vm240_vm0, %v1205_v39 }
 0xb1f   :  { %3255 = vmatprep.subr.bf16.mxu1 %v3254_v38 }
 0xb20   :  { %3257 = vmatpush3.bf16.msra.mxu1 %v3254_v38 }
 0xbf1   :  { %v3080_v58 = vpop.f32.mrb[10].mxu1 }
 0xbf2   :  { %v1295_v59 = vadd.f32 %v3080_v58, %v2850_v57  ;;  %v1289_v60 = vpop.f32.mrb[11].mxu1 }
 0xbf3   :  { %v1290_v61 = vadd.f32 %v2850_v57, %v1289_v60  ;;  %v2862_v60 = vld [vmem:[#allocation10 + $0x1] ss:$0 sm:$0xff] }
 0xbf4   :  { %v1301_v62 = vmul.f32 0.044715, %v1295_v59  ;;  %v1299_v13 = vmul.f32 0.5, %v1295_v59 }
 0xbf5   :  { %v1300_v63 = vmul.f32 0.044715, %v1290_v61  ;;  %v1298_v11 = vmul.f32 0.5, %v1290_v61 }
 0xbf6   :  { %v1303_v0 = vmul.f32 %v1301_v62, %v1295_v59 }
 0xbf7   :  { %v1302_v1 = vmul.f32 %v1300_v63, %v1290_v61 }
 0xbf8   :  { %v1305_v2 = vmul.f32 %v1303_v0, %v1295_v59 }
 0xbf9   :  { %v1304_v3 = vmul.f32 %v1302_v1, %v1290_v61 }
 0xbfa   :  { %v1307_v4 = vadd.f32 %v1305_v2, %v1295_v59 }
 0xbfb   :  { %v1306_v5 = vadd.f32 %v1304_v3, %v1290_v61 }
 0xbfc   :  { %v1309_v6 = vmul.f32 0.7978846, %v1307_v4 }
 0xbfd   :  { %v1308_v7 = vmul.f32 0.7978846, %v1306_v5 }
 0xbfe   :  { %3356 = vtanh.f32 %v1309_v6 }
 0xbff   :  { %3358 = vtanh.f32 %v1308_v7 }
 0xc08   :  { %v3357_v8 = vpop.eup %3356 }
 0xc09   :  { %v3359_v9 = vpop.eup %3358  ;;  %v1313_v10 = vadd.f32 1.0, %v3357_v8 }
 0xc0a   :  { %v1312_v12 = vadd.f32 1.0, %v3359_v9 }
 0xc0b   :  { %v1315_v15 = vmul.f32 %v1313_v10, %v1299_v13 }
 0xc0c   :  { %v1314_v14 = vmul.f32 %v1312_v12, %v1298_v11 }
 0xc0e   :  { %3097 = vmatprep.mubr.msk.f32.mxu0 %vm1331_vm4, %v1314_v14 }
 0xc0f   :  { %3098 = vmatmul.mubr.msk.f32.vlgmr.msra.gmra.mrb[10].mxu0 %vm1331_vm4, %v1315_v15 }
 0xc10   :  { %3123 = vmatprep.mubr.msk.f32.mxu0 %vm3736_vm1, %v3735_v36 }
 0xce2   :  { %v3099_v17 = vpop.f32.mrb[10].mxu0 }
 0xce3   :  { %v1410_v18 = vadd.f32 %v3099_v17, %v2853_v16  ;;  %v1404_v35 = vpop.f32.mrb[11].mxu0 }
 0xce4   :  { %v1405_v33 = vadd.f32 %v2853_v16, %v1404_v35 }
 0xce5   :  { %v1414_v19 = vadd.f32 %v1410_v18, %v1205_v39 }
 0xce6   :  { %v1413_v20 = vadd.f32 %v1405_v33, %v1204_v42  ;;  %v2861_v42 = vld [vmem:[%s4461_s24 + $0x38] sm:$0xff] }
 0xce7   :  { %v1420_v21 = vsel %vm240_vm0, %v1414_v19, 0.0  ;;  %v3258_v43 = vpack.c.bf16 %v2861_v42, %v2860_v40 }
 0xce8   :  { %1421 = vadd.xlane.f32.xlu1 %v1420_v21  ;;  %v1417_v22 = vsel %vm240_vm0, %v1413_v20, 0.0 }
 0xce9   :  { %1418 = vadd.xlane.f32.xlu0 %v1417_v22  ;;  %3259 = vmatprep.subr.bf16.mxu1 %v3258_v43 }
 0xcea   :  { %3261 = vmatpush3.bf16.msra.mxu1 %v3258_v43 }
 0xceb   :  { %3111 = vmatprep.subr.mxu1 %v3735_v36 }
 0xd75   :  { %v1422_v23 = vpop.xlane.xlu1 %1421 }
 0xd76   :  { %v1424_v24 = vmul.f32 0.03125, %v1422_v23  ;;  %v1419_v25 = vpop.xlane.xlu0 %1418 }
 0xd77   :  { %v1423_v26 = vmul.f32 0.03125, %v1419_v25 }
 0xd78   :  { %v1426_v27 = vsub.f32 %v1414_v19, %v1424_v24 }
 0xd79   :  { %v1425_v28 = vsub.f32 %v1413_v20, %v1423_v26 }
 0xd7a   :  { %v1428_v29 = vmul.f32 %v1426_v27, %v1426_v27 }
 0xd7b   :  { %v1427_v30 = vmul.f32 %v1425_v28, %v1425_v28 }
 0xd7c   :  { %v1432_v31 = vsel %vm240_vm0, %v1428_v29, 0.0 }
 0xd7d   :  { %1433 = vadd.xlane.f32.xlu1 %v1432_v31  ;;  %v1429_v32 = vsel %vm240_vm0, %v1427_v30, 0.0 }
 0xd7e   :  { %1430 = vadd.xlane.f32.xlu0 %v1429_v32 }
 0xe0a   :  { %v1434_v39 = vpop.xlane.xlu1 %1433 }
 0xe0b   :  { %v1436_v44 = vmul.f32 0.03125, %v1434_v39  ;;  %v1431_v46 = vpop.xlane.xlu0 %1430 }
 0xe0c   :  { %v1435_v47 = vmul.f32 0.03125, %v1431_v46 }
 0xe0d   :  { %v1438_v48 = vadd.f32 1e-12, %v1436_v44 }
 0xe0e   :  { %v1437_v49 = vadd.f32 1e-12, %v1435_v47 }
 0xe0f   :  { %3360 = vrsqrt.f32 %v1438_v48 }
 0xe10   :  { %3362 = vrsqrt.f32 %v1437_v49 }
 0xe19   :  { %v3361_v51 = vpop.eup %3360 }
 0xe1a   :  { %v3363_v41 = vpop.eup %3362  ;;  %v1442_v53 = vmul.f32 %v3361_v51, %v1426_v27 }
 0xe1b   :  { %v1441_v54 = vmul.f32 %v3363_v41, %v1425_v28 }
 0xe1c   :  { %v1450_v56 = vmul.f32 %v2856_v52, %v1442_v53 }
 0xe1d   :  { %v1449_v57 = vmul.f32 %v2856_v52, %v1441_v54 }
 0xe1e   :  { %v4226_v59 = vadd.f32 %v2857_v55, %v1450_v56 }
 0xe1f   :  { %v4224_v58 = vadd.f32 %v2857_v55, %v1449_v57 }
 0xe21   :  { %3108 = vmatprep.mubr.msk.f32.mxu1 %vm240_vm0, %v4224_v58 }
 0xe22   :  { %3109 = vmatmul.mubr.msk.f32.vlgmr.msra.gmra.mrb[12].mxu1 %vm240_vm0, %v4226_v59 }
 0xe23   :  { %3113 = vmatprep.mubr.msk.f32.mxu1 %vm3736_vm1, %v3735_v36 }
 0xef5   :  { %v3110_v61 = vpop.f32.mrb[12].mxu1 }
 0xef6   :  { %v4234_v62 = vadd.f32 %v3110_v61, %v2862_v60  ;;  %v1544_v63 = vpop.f32.mrb[13].mxu1 }
 0xef7   :  { %v4236_v0 = vadd.f32 %v2862_v60, %v1544_v63 }
 0xef8   :  { %1631 = vrot.lane.b32.xlu1 %v4234_v62, %s3737_s5 }
 0xef9   :  { %1554 = vrot.lane.b32.xlu0 %v4236_v0, %s3737_s5 }
 0xf6a   :  { %v1632_v2 = vpop.permute.xlu1 %1631 }
 0xf6b   :  { %v1555_v1 = vpop.permute.xlu0 %1554 }
 0xf6c   :  { %3112 = vmatpush3.xpose.msk.msra.mxu1 %vm381_vm2, %v1555_v1 }
 0xf6d   :  { %3116 = vmatprep.subr.mxu1 %v3735_v36 }
 0xf6f   :  { %3114 = vmatmul.mubr.msk.f32.vlgmr.msra.gmra.mrb[14].mxu1 %vm381_vm2, %v4236_v0 }
 0xf70   :  { %3117 = vmatpush3.xpose.msk.msra.mxu1 %vm381_vm2, %v1632_v2  ;;  %3118 = vmatprep.mubr.msk.f32.mxu1 %vm3736_vm1, %v3735_v36 }
 0xf71   :  { %3126 = vmatprep.subr.mxu1 %v3735_v36 }
 0xf73   :  { %3119 = vmatmul.mubr.msk.f32.vlgmr.msra.gmra.mrb[16].mxu1 %vm381_vm2, %v4234_v62 }
 0xf74   :  { %3128 = vmatprep.mubr.msk.f32.mxu1 %vm3736_vm1, %v3735_v36 }
0x1042   :  { %v1626_v3 = vpop.f32.mrb[14].mxu1 }
0x1043   :  { %v1707_v4 = vmul.f32 0.25, %v1626_v3  ;;  %v3115_v5 = vpop.f32.mrb[15].mxu1 }
0x1045   :  { %v1709_v6 = vadd.f32 %v4082_v45, %v1707_v4 }
0x1046   :  { %v1703_v7 = vpop.f32.mrb[16].mxu1 }
0x1047   :  { %v1708_v8 = vmul.f32 0.25, %v1703_v7  ;;  %v3120_v9 = vpop.f32.mrb[17].mxu1  ;;  %v1711_v10 = vsel %vm549_vm3, %v1709_v6, -inf  ;;  %v2877_v7 = vld [vmem:[%s4427_s6 + $0x20] sm:$0xff] }
0x1048   :  { %1712 = vmax.xlane.f32.xlu1 %v1711_v10  ;;  %v2879_v9 = vld [vmem:[%s4427_s6 + $0x30] sm:$0xff]  ;;  %v2880_v10 = vld [vmem:[%s4427_s6 + $0x38] sm:$0xff] }
0x1049   :  { %v1710_v11 = vadd.f32 %v4085_v50, %v1708_v8 }
0x104b   :  { %v1714_v12 = vsel %vm549_vm3, %v1710_v11, -inf }
0x104c   :  { %1715 = vmax.xlane.f32.xlu0 %v1714_v12 }
0x1059   :  { %1809 = vrot.lane.b32.xlu1 %v4234_v62, %s3738_s13 }
0x105d   :  { %1887 = vrot.lane.b32.xlu1 %v4236_v0, %s3739_s26 }
0x1061   :  { %1965 = vrot.lane.b32.xlu1 %v4234_v62, %s3739_s26 }
0x1062   :  { %1733 = vrot.lane.b32.xlu0 %v4236_v0, %s3738_s13 }
0x10d5   :  { %v1713_v13 = vpop.xlane.xlu1 %1712 }
0x10d6   :  { %v1717_v14 = vsub.f32 %v1709_v6, %v1713_v13 }
0x10d8   :  { %v1719_v15 = vmul.f32 1.442695, %v1717_v14 }
0x10d9   :  { %v1810_v16 = vpop.permute.xlu1 %1809  ;;  %v1716_v17 = vpop.xlane.xlu0 %1715 }
0x10da   :  { %3364 = vpow2.f32 %v1719_v15  ;;  %v1718_v18 = vsub.f32 %v1710_v11, %v1716_v17  ;;  %3127 = vmatpush3.msra.mxu1 %v1810_v16  ;;  %v3266_v11 = vpack.c.bf16 %v2880_v10, %v2879_v9  ;;  %v2890_v10 = vld [vmem:[#allocation16 + $0x1] ss:$0 sm:$0xff] }
0x10db   :  { %3136 = vmatprep.subr.mxu1 %v3735_v36 }
0x10dc   :  { %v1721_v35 = vmul.f32 1.442695, %v1718_v18 }
0x10dd   :  { %v1734_v33 = vpop.permute.xlu0 %1733  ;;  %v1888_v23 = vpop.permute.xlu1 %1887 }
0x10de   :  { %3366 = vpow2.f32 %v1721_v35  ;;  %3122 = vmatpush3.msra.mxu0 %v1734_v33  ;;  %v2881_v33 = vld [vmem:[#allocation11 + $0x1] ss:$0 sm:$0xff] }
0x10df   :  { %3131 = vmatprep.subr.mxu0 %v3735_v36 }
0x10e1   :  { %v1966_v24 = vpop.permute.xlu1 %1965 }
0x10e4   :  { %v3365_v19 = vpop.eup %3364 }
0x10e5   :  { %v1723_v20 = vsel %vm549_vm3, %v3365_v19, 0.0 }
0x10e6   :  { %1724 = vadd.xlane.f32.xlu0 %v1723_v20 }
0x10e8   :  { %v3367_v21 = vpop.eup %3366 }
0x10e9   :  { %v1726_v22 = vsel %vm549_vm3, %v3367_v21, 0.0 }
0x10ea   :  { %1727 = vadd.xlane.f32.xlu1 %v1726_v22 }
0x10fb   :  { %1963 = vrot.lane.b32.xlu1 %v4234_v62, %s3740_s11 }
0x10fc   :  { %1885 = vrot.lane.b32.xlu0 %v4236_v0, %s3740_s11 }
0x1173   :  { %v1725_v25 = vpop.xlane.xlu0 %1724 }
0x1174   :  { %3368 = vrcp.f32 %v1725_v25 }
0x1177   :  { %v1728_v26 = vpop.xlane.xlu1 %1727  ;;  %v1886_v31 = vpop.permute.xlu0 %1885 }
0x1178   :  { %3370 = vrcp.f32 %v1728_v26 }
0x117b   :  { %v1964_v32 = vpop.permute.xlu1 %1963 }
0x117e   :  { %v3369_v27 = vpop.eup %3368 }
0x117f   :  { %v1731_v28 = vmul.f32 %v3369_v27, %v3365_v19 }
0x1181   :  { %3124 = vmatmul.mubr.msk.f32.vlgmr.msra.gmra.mrb[12].mxu0 %vm549_vm3, %v1731_v28 }
0x1182   :  { %v3371_v29 = vpop.eup %3370  ;;  %3132 = vmatpush3.xpose.msk.msra.mxu0 %vm381_vm2, %v1888_v23  ;;  %3133 = vmatprep.mubr.msk.f32.mxu0 %vm3736_vm1, %v3735_v36 }
0x1183   :  { %v1732_v30 = vmul.f32 %v3371_v29, %v3367_v21  ;;  %3141 = vmatprep.subr.mxu0 %v3735_v36 }
0x1185   :  { %3129 = vmatmul.mubr.msk.f32.vlgmr.msra.gmra.mrb[18].mxu1 %vm549_vm3, %v1732_v30  ;;  %3134 = vmatmul.mubr.msk.f32.vlgmr.msra.gmra.mrb[14].mxu0 %vm381_vm2, %v1886_v31 }
0x1186   :  { %3137 = vmatpush3.xpose.msk.msra.mxu1 %vm381_vm2, %v1966_v24  ;;  %3138 = vmatprep.mubr.msk.f32.mxu1 %vm3736_vm1, %v3735_v36 }
0x1187   :  { %3146 = vmatprep.subr.mxu1 %v3735_v36  ;;  %3143 = vmatprep.mubr.msk.f32.mxu0 %vm3736_vm1, %v3735_v36 }
0x1189   :  { %3139 = vmatmul.mubr.msk.f32.vlgmr.msra.gmra.mrb[20].mxu1 %vm381_vm2, %v1964_v32 }
0x118a   :  { %3148 = vmatprep.mubr.msk.f32.mxu1 %vm3736_vm1, %v3735_v36 }
0x1254   :  { %v4290_v34 = vpop.f32.mrb[12].mxu0 }
0x1255   :  { %v3125_v37 = vpop.f32.mrb[13].mxu0 }
0x1258   :  { %v4292_v38 = vpop.f32.mrb[18].mxu1  ;;  %v1959_v40 = vpop.f32.mrb[14].mxu0 }
0x1259   :  { %v2041_v42 = vmul.f32 0.25, %v1959_v40  ;;  %v3130_v43 = vpop.f32.mrb[19].mxu1  ;;  %v3135_v39 = vpop.f32.mrb[15].mxu0  ;;  %v2887_v40 = vld [vmem:[%s4431_s10 + $0x28] sm:$0xff] }
0x125a   :  { %v2888_v43 = vld [vmem:[%s4431_s10 + $0x30] sm:$0xff]  ;;  %v2889_v39 = vld [vmem:[%s4431_s10 + $0x38] sm:$0xff] }
0x125b   :  { %v2043_v44 = vadd.f32 %v4082_v45, %v2041_v42 }
0x125c   :  { %v2037_v46 = vpop.f32.mrb[20].mxu1 }
0x125d   :  { %v2042_v47 = vmul.f32 0.25, %v2037_v46  ;;  %v3140_v48 = vpop.f32.mrb[21].mxu1  ;;  %v2045_v49 = vsel %vm549_vm3, %v2043_v44, -inf }
0x125e   :  { %2046 = vmax.xlane.f32.xlu0 %v2045_v49 }
0x125f   :  { %v2044_v51 = vadd.f32 %v4085_v50, %v2042_v47 }
0x1261   :  { %v2048_v52 = vsel %vm549_vm3, %v2044_v51, -inf }
0x1262   :  { %2049 = vmax.xlane.f32.xlu1 %v2048_v52 }
0x1273   :  { %2143 = vrot.lane.b32.xlu1 %v4234_v62, %s3741_s18 }
0x12eb   :  { %v2047_v41 = vpop.xlane.xlu0 %2046 }
0x12ec   :  { %v2051_v53 = vsub.f32 %v2043_v44, %v2047_v41  ;;  %v3274_v44 = vpack.c.bf16 %v2889_v39, %v2888_v43 }
0x12ee   :  { %v2053_v54 = vmul.f32 1.442695, %v2051_v53  ;;  %v2884_v53 = vld [vmem:[#allocation13 + $0x1] ss:$0 sm:$0xff] }
0x12ef   :  { %v2050_v55 = vpop.xlane.xlu1 %2049 }
0x12f0   :  { %3372 = vpow2.f32 %v2053_v54  ;;  %v2052_v45 = vsub.f32 %v2044_v51, %v2050_v55  ;;  %v2885_v55 = vld [vmem:[#allocation14 + $0x1] ss:$0 sm:$0xff] }
0x12f2   :  { %v2055_v56 = vmul.f32 1.442695, %v2052_v45 }
0x12f3   :  { %v2144_v57 = vpop.permute.xlu1 %2143 }
0x12f4   :  { %3374 = vpow2.f32 %v2055_v56  ;;  %3147 = vmatpush3.msra.mxu1 %v2144_v57 }
0x12fa   :  { %v3373_v60 = vpop.eup %3372 }
0x12fb   :  { %v2057_v61 = vsel %vm549_vm3, %v3373_v60, 0.0 }
0x12fc   :  { %2058 = vadd.xlane.f32.xlu0 %v2057_v61 }
0x12fe   :  { %v3375_v50 = vpop.eup %3374 }
0x12ff   :  { %v2060_v63 = vsel %vm549_vm3, %v3375_v50, 0.0 }
0x1300   :  { %2061 = vadd.xlane.f32.xlu0 %v2060_v63  ;;  %v2893_v63 = vld [vmem:[%s4433_s12 + $0x40] sm:$0xff] }
0x1316   :  { %2067 = vrot.lane.b32.xlu0 %v4236_v0, %s3741_s18  ;;  %v2878_v0 = vld [vmem:[%s4427_s6 + $0x28] sm:$0xff] }
0x1317   :  { %v3262_v8 = vpack.c.bf16 %v2878_v0, %v2877_v7  ;;  %v2899_v0 = vld [vmem:[%s4433_s12 + $0x70] sm:$0xff] }
0x1389   :  { %v2059_v62 = vpop.xlane.xlu0 %2058 }
0x138a   :  { %3376 = vrcp.f32 %v2059_v62  ;;  %v2894_v62 = vld [vmem:[%s4433_s12 + $0x48] sm:$0xff] }
0x138d   :  { %v2062_v1 = vpop.xlane.xlu0 %2061 }
0x138e   :  { %3378 = vrcp.f32 %v2062_v1  ;;  %v3278_v1 = vpack.c.bf16 %v2894_v62, %v2893_v63 }
0x1391   :  { %v2068_v2 = vpop.permute.xlu0 %2067 }
0x1392   :  { %3142 = vmatpush3.msra.mxu0 %v2068_v2  ;;  %v2895_v2 = vld [vmem:[%s4433_s12 + $0x50] sm:$0xff] }
0x1393   :  { %3263 = vmatprep.subr.bf16.mxu0 %v3262_v8 }
0x1394   :  { %v3377_v3 = vpop.eup %3376 }
0x1395   :  { %v2065_v4 = vmul.f32 %v3377_v3, %v3373_v60  ;;  %v2896_v3 = vld [vmem:[%s4433_s12 + $0x58] sm:$0xff] }
0x1397   :  { %3144 = vmatmul.mubr.msk.f32.vlgmr.msra.gmra.mrb[16].mxu0 %vm549_vm3, %v2065_v4  ;;  %v3282_v4 = vpack.c.bf16 %v2896_v3, %v2895_v2 }
0x1398   :  { %v3379_v5 = vpop.eup %3378  ;;  %3265 = vmatpush3.bf16.msra.mxu0 %v3262_v8  ;;  %v2900_v8 = vld [vmem:[%s4433_s12 + $0x78] sm:$0xff] }
0x1399   :  { %v2066_v6 = vmul.f32 %v3379_v5, %v3375_v50  ;;  %3267 = vmatprep.subr.bf16.mxu0 %v3266_v11  ;;  %v2897_v5 = vld [vmem:[%s4433_s12 + $0x60] sm:$0xff]  ;;  %v3290_v9 = vpack.c.bf16 %v2900_v8, %v2899_v0 }
0x139a   :  { %v2905_v0 = vld [vmem:[#allocation20 + $0x1] ss:$0 sm:$0xff] }
0x139b   :  { %3149 = vmatmul.mubr.msk.f32.vlgmr.msra.gmra.mrb[22].mxu1 %vm549_vm3, %v2066_v6  ;;  %v2898_v6 = vld [vmem:[%s4433_s12 + $0x68] sm:$0xff] }
0x139c   :  { %3269 = vmatpush3.bf16.msra.mxu0 %v3266_v11  ;;  %v3286_v7 = vpack.c.bf16 %v2898_v6, %v2897_v5 }
0x139d   :  { %3279 = vmatprep.subr.bf16.mxu0 %v3278_v1 }
0x146a   :  { %v2139_v12 = vpop.f32.mrb[16].mxu0 }
0x146b   :  { %2221 = vrot.lane.b32.xlu1 %v2139_v12, %s3719_s29  ;;  %v3145_v13 = vpop.f32.mrb[17].mxu0 }
0x146e   :  { %v2215_v14 = vpop.f32.mrb[22].mxu1 }
0x146f   :  { %2223 = vrot.lane.b32.xlu1 %v2215_v14, %s3719_s29  ;;  %v3150_v15 = vpop.f32.mrb[23].mxu1 }
0x14dd   :  { %v2222_v16 = vpop.permute.xlu1 %2221 }
0x14de   :  { %v2227_v17 = vsel %vm381_vm2, %v4290_v34, %v2222_v16 }
0x14df   :  { %3159 = vmatprep.mubr.msk.f32.mxu0 %vm240_vm0, %v2227_v17 }
0x14e1   :  { %v2224_v18 = vpop.permute.xlu1 %2223 }
0x14e2   :  { %v2228_v35 = vsel %vm381_vm2, %v4292_v38, %v2224_v18 }
0x14e3   :  { %3160 = vmatmul.mubr.msk.f32.vlgmr.msra.gmra.mrb[18].mxu0 %vm240_vm0, %v2228_v35 }
0x14e4   :  { %3281 = vmatpush3.bf16.msra.mxu0 %v3278_v1 }
0x14e5   :  { %3283 = vmatprep.subr.bf16.mxu0 %v3282_v4 }
0x14e8   :  { %3285 = vmatpush3.bf16.msra.mxu0 %v3282_v4  ;;  %v2904_v4 = vld [vmem:[#allocation19 + $0x1] ss:$0 sm:$0xff] }
0x14e9   :  { %3287 = vmatprep.subr.bf16.mxu0 %v3286_v7 }
0x14ec   :  { %3289 = vmatpush3.bf16.msra.mxu0 %v3286_v7 }
0x14ed   :  { %3291 = vmatprep.subr.bf16.mxu0 %v3290_v9 }
0x14f0   :  { %3293 = vmatpush3.bf16.msra.mxu0 %v3290_v9 }
0x15b6   :  { %v3161_v19 = vpop.f32.mrb[18].mxu0 }
0x15b7   :  { %v2320_v20 = vadd.f32 %v3161_v19, %v2881_v33  ;;  %v2314_v21 = vpop.f32.mrb[19].mxu0 }
0x15b8   :  { %v2315_v22 = vadd.f32 %v2881_v33, %v2314_v21 }
0x15b9   :  { %v2324_v23 = vadd.f32 %v2320_v20, %v4226_v59 }
0x15ba   :  { %v2323_v24 = vadd.f32 %v2315_v22, %v4224_v58  ;;  %v2886_v58 = vld [vmem:[%s4431_s10 + $0x20] sm:$0xff] }
0x15bb   :  { %v2332_v25 = vsel %vm240_vm0, %v2324_v23, 0.0  ;;  %v3270_v42 = vpack.c.bf16 %v2887_v40, %v2886_v58 }
0x15bc   :  { %2333 = vadd.xlane.f32.xlu1 %v2332_v25  ;;  %v2329_v26 = vsel %vm240_vm0, %v2323_v24, 0.0 }
0x15bd   :  { %2330 = vadd.xlane.f32.xlu0 %v2329_v26  ;;  %3271 = vmatprep.subr.bf16.mxu1 %v3270_v42 }
0x15be   :  { %3273 = vmatpush3.bf16.msra.mxu1 %v3270_v42 }
0x15bf   :  { %3275 = vmatprep.subr.bf16.mxu1 %v3274_v44 }
0x15c2   :  { %3277 = vmatpush3.bf16.msra.mxu1 %v3274_v44 }
0x1649   :  { %v2334_v27 = vpop.xlane.xlu1 %2333 }
0x164a   :  { %v2336_v28 = vmul.f32 0.03125, %v2334_v27  ;;  %v2331_v29 = vpop.xlane.xlu0 %2330 }
0x164b   :  { %v2335_v30 = vmul.f32 0.03125, %v2331_v29 }
0x164c   :  { %v2338_v31 = vsub.f32 %v2324_v23, %v2336_v28 }
0x164d   :  { %v2337_v32 = vsub.f32 %v2323_v24, %v2335_v30 }
0x164e   :  { %v2340_v38 = vmul.f32 %v2338_v31, %v2338_v31 }
0x164f   :  { %v2339_v34 = vmul.f32 %v2337_v32, %v2337_v32 }
0x1650   :  { %v2344_v59 = vsel %vm240_vm0, %v2340_v38, 0.0 }
0x1651   :  { %v2341_v37 = vsel %vm240_vm0, %v2339_v34, 0.0 }
0x1652   :  { %2342 = vadd.xlane.f32.xlu0 %v2341_v37 }
0x1656   :  { %2345 = vadd.xlane.f32.xlu0 %v2344_v59 }
0x16df   :  { %v2343_v46 = vpop.xlane.xlu0 %2342 }
0x16e0   :  { %v2347_v47 = vmul.f32 0.03125, %v2343_v46 }
0x16e2   :  { %v2349_v48 = vadd.f32 1e-12, %v2347_v47 }
0x16e3   :  { %v2346_v49 = vpop.xlane.xlu0 %2345 }
0x16e4   :  { %3380 = vrsqrt.f32 %v2349_v48  ;;  %v2348_v51 = vmul.f32 0.03125, %v2346_v49 }
0x16e6   :  { %v2350_v52 = vadd.f32 1e-12, %v2348_v51 }
0x16e8   :  { %3382 = vrsqrt.f32 %v2350_v52 }
0x16ee   :  { %v3381_v41 = vpop.eup %3380 }
0x16ef   :  { %v2353_v54 = vmul.f32 %v3381_v41, %v2337_v32 }
0x16f1   :  { %v2361_v45 = vmul.f32 %v2884_v53, %v2353_v54  ;;  %v2635_v54 = vld [vmem:[%s4437_s16 + $0x8] sm:$0xff] }
0x16f2   :  { %v3383_v56 = vpop.eup %3382 }
0x16f3   :  { %v2354_v57 = vmul.f32 %v3383_v56, %v2338_v31  ;;  %v2369_v60 = vadd.f32 %v2885_v55, %v2361_v45  ;;  %v2901_v31 = vld [vmem:[#allocation17 + $0x1] ss:$0 sm:$0xff]  ;;  %v2636_v45 = vld [vmem:[%s4437_s16 + $0x10] sm:$0xff]  ;;  %v2637_v56 = vld [vmem:[%s4437_s16 + $0x18] sm:$0xff] }
0x16f5   :  { %v2362_v61 = vmul.f32 %v2884_v53, %v2354_v57  ;;  %3170 = vmatprep.mubr.msk.f32.mxu1 %vm240_vm0, %v2369_v60  ;;  %v2634_v53 = vld [vmem:[%s4437_s16] sm:$0xff]  ;;  %v3742_v57 = vmov 0.0|0.0  }
0x16f6   :  { %3294 = vmatprep.subr.bf16.mxu1 %v3742_v57 }
0x16f7   :  { %v2370_v50 = vadd.f32 %v2885_v55, %v2362_v61  ;;  %v3295_v55 = vpack.c.bf16 %v2635_v54, %v2634_v53 }
0x16f9   :  { %3171 = vmatmul.mubr.msk.f32.vlgmr.msra.gmra.mrb[24].mxu1 %vm240_vm0, %v2370_v50 }
0x16fa   :  { %3200 = vmatprep.mubr.msk.f32.mxu1 %vm3736_vm1, %v3735_v36  ;;  %3296 = vmatpush3.bf16.msra.mxu1 %v3295_v55 }
0x16fb   :  { %3297 = vmatprep.subr.bf16.mxu1 %v3742_v57 }
0x17cc   :  { %v3172_v11 = vpop.f32.mrb[24].mxu1 }
0x17cd   :  { %v2462_v12 = vadd.f32 %v3172_v11, %v2890_v10  ;;  %v2456_v13 = vpop.f32.mrb[25].mxu1 }
0x17ce   :  { %v2457_v14 = vadd.f32 %v2890_v10, %v2456_v13 }
0x17cf   :  { %v2468_v15 = vmul.f32 0.044715, %v2462_v12  ;;  %v2466_v28 = vmul.f32 0.5, %v2462_v12 }
0x17d0   :  { %v2467_v16 = vmul.f32 0.044715, %v2457_v14  ;;  %v2465_v26 = vmul.f32 0.5, %v2457_v14 }
0x17d1   :  { %v2470_v17 = vmul.f32 %v2468_v15, %v2462_v12  ;;  %v2720_v15 = vld [vmem:[%s4462_s0 + $0x8] sm:$0xff] }
0x17d2   :  { %v2469_v18 = vmul.f32 %v2467_v16, %v2457_v14  ;;  %v2721_v16 = vld [vmem:[%s4462_s0 + $0x10] sm:$0xff] }
0x17d3   :  { %v2472_v35 = vmul.f32 %v2470_v17, %v2462_v12 }
0x17d4   :  { %v2471_v33 = vmul.f32 %v2469_v18, %v2457_v14  ;;  %v2722_v18 = vld [vmem:[%s4462_s0 + $0x18] sm:$0xff] }
0x17d5   :  { %v2474_v19 = vadd.f32 %v2472_v35, %v2462_v12  ;;  %v3304_v35 = vpack.c.bf16 %v2722_v18, %v2721_v16 }
0x17d6   :  { %v2473_v20 = vadd.f32 %v2471_v33, %v2457_v14  ;;  %v2719_v14 = vld [vmem:[%s4462_s0] sm:$0xff] }
0x17d7   :  { %v2476_v21 = vmul.f32 0.7978846, %v2474_v19  ;;  %v3301_v17 = vpack.c.bf16 %v2720_v15, %v2719_v14 }
0x17d8   :  { %v2475_v22 = vmul.f32 0.7978846, %v2473_v20 }
0x17d9   :  { %3384 = vtanh.f32 %v2476_v21 }
0x17da   :  { %3386 = vtanh.f32 %v2475_v22  ;;  %v2908_v22 = vld [vmem:[%s4463_s30] ss:$0 sm:$0xff] }
0x17e3   :  { %v3385_v23 = vpop.eup %3384 }
0x17e4   :  { %v3387_v24 = vpop.eup %3386  ;;  %v2480_v25 = vadd.f32 1.0, %v3385_v23 }
0x17e5   :  { %v2479_v27 = vadd.f32 1.0, %v3387_v24 }
0x17e6   :  { %v2482_v30 = vmul.f32 %v2480_v25, %v2466_v28 }
0x17e7   :  { %v2481_v29 = vmul.f32 %v2479_v27, %v2465_v26 }
0x17e9   :  { %3189 = vmatprep.mubr.msk.f32.mxu0 %vm1331_vm4, %v2481_v29 }
0x17ea   :  { %3190 = vmatmul.mubr.msk.f32.vlgmr.msra.gmra.mrb[20].mxu0 %vm1331_vm4, %v2482_v30 }
0x18bd   :  { %v3191_v32 = vpop.f32.mrb[20].mxu0 }
0x18be   :  { %v2578_v34 = vadd.f32 %v3191_v32, %v2901_v31  ;;  %v2572_v37 = vpop.f32.mrb[21].mxu0 }
0x18bf   :  { %v2573_v38 = vadd.f32 %v2901_v31, %v2572_v37 }
0x18c0   :  { %v2582_v59 = vadd.f32 %v2578_v34, %v2370_v50 }
0x18c1   :  { %v2581_v58 = vadd.f32 %v2573_v38, %v2369_v60  ;;  %v3298_v60 = vpack.c.bf16 %v2637_v56, %v2636_v45 }
0x18c2   :  { %v2590_v40 = vsel %vm240_vm0, %v2582_v59, 0.0 }
0x18c3   :  { %2591 = vadd.xlane.f32.xlu0 %v2590_v40  ;;  %v2587_v42 = vsel %vm240_vm0, %v2581_v58, 0.0  ;;  %3299 = vmatpush3.bf16.msra.mxu1 %v3298_v60 }
0x18c4   :  { %2588 = vadd.xlane.f32.xlu1 %v2587_v42  ;;  %3300 = vmatprep.subr.bf16.mxu1 %v3742_v57 }
0x1950   :  { %v2592_v43 = vpop.xlane.xlu0 %2591 }
0x1951   :  { %v2594_v39 = vmul.f32 0.03125, %v2592_v43  ;;  %v2589_v44 = vpop.xlane.xlu1 %2588 }
0x1952   :  { %v2593_v46 = vmul.f32 0.03125, %v2589_v44 }
0x1953   :  { %v2596_v47 = vsub.f32 %v2582_v59, %v2594_v39 }
0x1954   :  { %v2595_v48 = vsub.f32 %v2581_v58, %v2593_v46 }
0x1955   :  { %v2598_v49 = vmul.f32 %v2596_v47, %v2596_v47 }
0x1956   :  { %v2597_v51 = vmul.f32 %v2595_v48, %v2595_v48 }
0x1957   :  { %v2602_v52 = vsel %vm240_vm0, %v2598_v49, 0.0 }
0x1958   :  { %2603 = vadd.xlane.f32.xlu0 %v2602_v52  ;;  %v2599_v41 = vsel %vm240_vm0, %v2597_v51, 0.0 }
0x1959   :  { %2600 = vadd.xlane.f32.xlu1 %v2599_v41 }
0x19e5   :  { %v2604_v61 = vpop.xlane.xlu0 %2603 }
0x19e6   :  { %v2606_v50 = vmul.f32 0.03125, %v2604_v61  ;;  %v2601_v63 = vpop.xlane.xlu1 %2600 }
0x19e7   :  { %v2605_v62 = vmul.f32 0.03125, %v2601_v63 }
0x19e8   :  { %v2608_v1 = vadd.f32 1e-12, %v2606_v50 }
0x19e9   :  { %v2607_v2 = vadd.f32 1e-12, %v2605_v62 }
0x19ea   :  { %3388 = vrsqrt.f32 %v2608_v1 }
0x19eb   :  { %3390 = vrsqrt.f32 %v2607_v2 }
0x19f4   :  { %v3389_v3 = vpop.eup %3388 }
0x19f5   :  { %v3391_v5 = vpop.eup %3390  ;;  %v2612_v6 = vmul.f32 %v3389_v3, %v2596_v47 }
0x19f6   :  { %v2611_v7 = vmul.f32 %v3391_v5, %v2595_v48 }
0x19f7   :  { %v2620_v8 = vmul.f32 %v2904_v4, %v2612_v6 }
0x19f8   :  { %v2619_v9 = vmul.f32 %v2904_v4, %v2611_v7 }
0x19f9   :  { %v2628_v10 = vadd.f32 %v2905_v0, %v2620_v8 }
0x19fa   :  { %v2627_v11 = vadd.f32 %v2905_v0, %v2619_v9 }
0x19fb   :  { %v2630_v12 = vrot.slane %v2628_v10, 7 }
0x19fd   :  { %v2633_v13 = vsel %vm2632_vm5, %v2627_v11, %v2630_v12 }
0x19fe   :  { %3201 = vmatmul.mubr.msk.f32.vlgmr.msra.gmra.mrb[26].mxu1 %vm240_vm0, %v2633_v13 }
0x19ff   :  { %3211 = vmatprep.mubr.msk.f32.mxu1 %vm3736_vm1, %v3735_v36  ;;  %3302 = vmatpush3.bf16.msra.mxu1 %v3301_v17  ;;  %v2906_v36 = vld [vmem:[#allocation22] ss:$0 sm:$0xff] }
0x1a00   :  { %3303 = vmatprep.subr.bf16.mxu1 %v3742_v57 }
0x1a03   :  { %3305 = vmatpush3.bf16.msra.mxu1 %v3304_v35 }
0x1ad1   :  { %v2714_v33 = vpop.f32.mrb[26].mxu1 }
0x1ad2   :  { %v2715_v19 = vadd.f32 %v2906_v36, %v2714_v33  ;;  %v3202_v20 = vpop.f32.mrb[27].mxu1 }
0x1ad4   :  { %3392 = vtanh.f32 %v2715_v19 }
0x1ade   :  { %v3393_v21 = vpop.eup %3392 }
0x1adf   :  { %3212 = vmatmul.mubr.msk.f32.vlgmr.msra.gmra.mrb[28].mxu1 %vm240_vm0, %v3393_v21 }
0x1bb2   :  { %v2799_v23 = vpop.f32.mrb[28].mxu1 }
0x1bb3   :  { %v2800_v24 = vadd.f32 %v2908_v22, %v2799_v23  ;;  %v3213_v25 = vpop.f32.mrb[29].mxu1 }
0x1bb5   :  { %2804 = vst.msk [vmem:[#allocation23] sm:$0x3] %vm2803_vm6, %v2800_v24 }
0x1bb6   :  { %3691 = shalt.err (!%p3688_p10)
}
0x1bb7   :  { %s4464_s25 = sld [smem:[#allocation39_spill]] }
0x1bbd   :  { %s3692_s15 = scalar_lea.hbm %s4464_s25, 32 }
0x1bbe   :  { %p3693_p11 = scmp.ne.s32.totalorder %s4464_s25, %s3692_s15  ;;  %p3696_p12 = scmp.lt.u32.totalorder %s3692_s15, %s4464_s25 }
0x1bc0   :  { %p3698_p13 = pnand %p3696_p12, %p3693_p11 }
0x1bc2   :  { %3701 = shalt.err (!%p3698_p13)
}
0x1bc3   :  { %2814 = dma.vmem_to_hbm [thread:$0]  %s2812_s22, 32, %s4464_s25, [#allocation4]  }
0x1bc4   :  { %3716 = dma.done.wait [#allocation4], 32  }
0x1bc5   :  { %3717 = vsyncadd [#allocation4], 4294967264 }
0x1bc6   :  { %2818 = vsyncpa [#allocation3], 1 }
0x1bc7   :  { %2819 = vsyncpa [#allocation6], 1 }
0x1bc8   :  { %2820 = vsyncpa [#allocation9], 1 }
0x1bc9   :  { %2821 = vsyncpa [#allocation12], 1 }
0x1bca   :  { %2822 = vsyncpa [#allocation15], 1 }
0x1bcb   :  { %2823 = vsyncpa [#allocation18], 1 }
0x1bcc   :  { %2824 = vsyncpa [#allocation21], 1 }
0x1bcd   :  { %2825 = vsyncpa [#allocation4], 1 }

</bundles_post_ra>
